<compile_context>
chip_gen: v6e
topology: v6e:2x2x1
jax: 0.10.0
libtpu: 0.0.40
codegen_flags: <defaults>
</compile_context>

<pallas_src>
import functools

import jax
import jax.numpy as jnp
from jax.experimental import pallas as pl
from jax.experimental.pallas import tpu as pltpu

LANE = 128
SUBLANE = 8


def mlp_kernel(x_ref, w1_ref, b1_ref, w2_ref, b2_ref, w3_ref, b3_ref, o_ref):
    """relu(x@W1+b1) -> relu(h@W2+b2) -> h@W3+b3 for one batch tile."""
    x = x_ref[...]                                                    # bf16 (TM, K)
    # Layer 1 (MyLinear_new) + ReLU. bf16 MXU inputs, f32 accumulation/elementwise.
    h1 = jnp.dot(x, w1_ref[...], preferred_element_type=jnp.float32) + b1_ref[...]
    h1 = jnp.maximum(h1, 0.0)
    # Layer 2 (nn.Linear) + ReLU.
    h2 = (jnp.dot(h1.astype(w2_ref.dtype), w2_ref[...],
                  preferred_element_type=jnp.float32) + b2_ref[...])
    h2 = jnp.maximum(h2, 0.0)
    # Layer 3 (nn.Linear): lane-dense 128-wide bf16 store (real cols sliced outside).
    o_ref[...] = (jnp.dot(h2.astype(w3_ref.dtype), w3_ref[...],
                          preferred_element_type=jnp.float32)
                  + b3_ref[...]).astype(o_ref.dtype)


def _pad_axis_to(a, axis, target):
    pad = target - a.shape[axis]
    if pad <= 0:
        return a
    widths = [(0, 0)] * a.ndim
    widths[axis] = (0, pad)
    return jnp.pad(a, widths)


def _pad_axis_to_multiple(a, axis, multiple):
    return _pad_axis_to(a, axis, multiple * int(pl.cdiv(a.shape[axis], multiple)))


@functools.partial(jax.jit, static_argnames=("tm", "single_buffer_weights"))
def _forward_impl(x, params, *, tm, single_buffer_weights):
    w1, b1, w2, b2, w3, b3 = params
    batch, in_dim = x.shape
    label_num = w3.shape[1]

    # --- lane-dense padding of hidden/output feature dims (zeros are inert).
    #     in_dim (layer-1 contraction K) is intentionally left unpadded. ---
    w1p = _pad_axis_to_multiple(w1, 1, LANE)
    b1p = _pad_axis_to_multiple(b1, 1, LANE)
    w2p = _pad_axis_to_multiple(_pad_axis_to_multiple(w2, 0, LANE), 1, LANE)
    b2p = _pad_axis_to_multiple(b2, 1, LANE)
    w3p = _pad_axis_to_multiple(_pad_axis_to_multiple(w3, 0, LANE), 1, LANE)
    b3p = _pad_axis_to_multiple(b3, 1, LANE)
    h1p, h2p, outp = w1p.shape[1], w2p.shape[1], w3p.shape[1]

    # --- bf16 MXU inputs; biases / elementwise math stay f32. ---
    xc = x.astype(jnp.bfloat16)
    w1c, w2c, w3c = (w.astype(jnp.bfloat16) for w in (w1p, w2p, w3p))

    # --- batch tiling: one big tile when it fits in tm; otherwise an even tile
    #     count so the "parallel" batch axis shards evenly over v7x's two TCs. ---
    batch_r = SUBLANE * int(pl.cdiv(batch, SUBLANE))
    tm = max(SUBLANE, (int(min(tm, batch_r)) // SUBLANE) * SUBLANE)
    n_tiles = int(pl.cdiv(batch_r, tm))
    if n_tiles > 1 and n_tiles % 2 == 1:
        n_tiles += 1
        tm = SUBLANE * int(pl.cdiv(int(pl.cdiv(batch_r, n_tiles)), SUBLANE))
    padded_batch = n_tiles * tm
    xc = _pad_axis_to(xc, 0, padded_batch)
    grid = (n_tiles,)

    # Constant-index weight/bias blocks: fetched once, so single-buffer them.
    def const_spec(shape):
        if single_buffer_weights:
            return pl.BlockSpec(shape, lambda i: (0, 0), pipeline_mode=pl.Buffered(1))
        return pl.BlockSpec(shape, lambda i: (0, 0))

    flops = 2 * padded_batch * (in_dim * h1p + h1p * h2p + h2p * outp)
    bytes_accessed = (xc.size * 2                               # bf16 activations in
                      + (w1c.size + w2c.size + w3c.size) * 2    # bf16 weights
                      + (b1p.size + b2p.size + b3p.size) * 4    # f32 biases
                      + padded_batch * outp * 2)                # bf16 output

    out_padded = pl.pallas_call(
        mlp_kernel,
        out_shape=jax.ShapeDtypeStruct((padded_batch, outp), jnp.bfloat16),
        grid=grid,
        in_specs=[
            pl.BlockSpec((tm, in_dim), lambda i: (i, 0)),   # x tile: streamed / double-buffered
            const_spec((in_dim, h1p)),                      # weights/biases: VMEM-resident
            const_spec((1, h1p)),
            const_spec((h1p, h2p)),
            const_spec((1, h2p)),
            const_spec((h2p, outp)),
            const_spec((1, outp)),
        ],
        out_specs=pl.BlockSpec((tm, outp), lambda i: (i, 0)),
        compiler_params=pltpu.CompilerParams(
            dimension_semantics=("parallel",),   # shard batch tiles across TCs (v7x)
        ),
        cost_estimate=pl.CostEstimate(
            flops=flops, transcendentals=0, bytes_accessed=bytes_accessed),
    )(xc, w1c, b1p, w2c, b2p, w3c, b3p)

    # TODO(synk): if hidden sizes grow until 2x(all weights) approaches the scoped
    # VMEM limit (hits first on v7x's 64 MiB), add an "arbitrary" feature grid axis
    # instead of keeping every weight VMEM-resident.
    return out_padded[:batch, :label_num].astype(jnp.float32)


def neural_network_forward(x, params, *, tm=256):
    """Fused MLP forward. Prefers single-buffered (pl.Buffered(1)) weight blocks;
    falls back to default double-buffering if the jax/pallas version rejects it."""
    try:
        return _forward_impl(x, params, tm=tm, single_buffer_weights=True)
    except Exception:
        return _forward_impl(x, params, tm=tm, single_buffer_weights=False)


def init_params(key, input_dim, hidden_size1, hidden_size2, label_num):
    """PyTorch-style uniform(-1/sqrt(fan_in), +1/sqrt(fan_in)) init."""
    ks = jax.random.split(key, 6)

    def lin(kw, kb, fan_in, fan_out):
        bound = 1.0 / jnp.sqrt(fan_in)
        w = jax.random.uniform(kw, (fan_in, fan_out), jnp.float32, -bound, bound)
        b = jax.random.uniform(kb, (1, fan_out), jnp.float32, -bound, bound)
        return w, b

    w1, b1 = lin(ks[0], ks[1], input_dim, hidden_size1)     # MyLinear_new
    w2, b2 = lin(ks[2], ks[3], hidden_size1, hidden_size2)  # l2
    w3, b3 = lin(ks[4], ks[5], hidden_size2, label_num)     # l3
    return w1, b1, w2, b2, w3, b3


def reference_forward_bf16(x, params):
    """Pure-JAX reference with the same bf16-input / f32-accumulate matmuls."""
    w1, b1, w2, b2, w3, b3 = params
    bf = jnp.bfloat16
    h1 = jnp.maximum(
        jnp.dot(x.astype(bf), w1.astype(bf), preferred_element_type=jnp.float32) + b1, 0.0)
    h2 = jnp.maximum(
        jnp.dot(h1.astype(bf), w2.astype(bf), preferred_element_type=jnp.float32) + b2, 0.0)
    return jnp.dot(h2.astype(bf), w3.astype(bf), preferred_element_type=jnp.float32) + b3


def reference_forward_f32(x, params):
    w1, b1, w2, b2, w3, b3 = params
    h1 = jnp.maximum(x @ w1 + b1, 0.0)
    h2 = jnp.maximum(h1 @ w2 + b2, 0.0)
    return h2 @ w3 + b3


if __name__ == "__main__":
    # Feature dims match the original toy module; tm=256 gives a single batch
    # tile (grid=(1,)) for this overhead-bound problem size.
    batch, input_dim, hidden_size1, hidden_size2, label_num = 256, 32, 64, 32, 4

    key = jax.random.PRNGKey(0)
    kx, kp = jax.random.split(key)
    x = jax.random.normal(kx, (batch, input_dim), dtype=jnp.float32)
    params = init_params(kp, input_dim, hidden_size1, hidden_size2, label_num)

    out = neural_network_forward(x, params, tm=256)
    out = jax.block_until_ready(out)
    assert out.shape == (batch, label_num)

    # Check vs a matching-precision reference (bf16 matmuls, f32 accumulation);
    # tolerance widened slightly for the kernel's bf16 output store.
    ref_bf16 = reference_forward_bf16(x, params)
    assert jnp.allclose(out, ref_bf16, atol=3e-2, rtol=3e-2), "mismatch vs bf16 reference"

    # Loose semantic check vs the full-f32 PyTorch-equivalent forward.
    ref_f32 = reference_forward_f32(x, params)
    assert jnp.allclose(out, ref_f32, atol=2e-1, rtol=2e-1), "mismatch vs f32 reference"

    print("KERNEL_OK")
</pallas_src>

<mosaic_0001>
module attributes {stable_mosaic.version = 11 : i64} {
  func.func @mlp_kernel(%arg0: i32, %arg1: memref<256x32xbf16, #tpu.memory_space<vmem>>, %arg2: memref<32x128xbf16, #tpu.memory_space<vmem>>, %arg3: memref<1x128xf32, #tpu.memory_space<vmem>>, %arg4: memref<128x128xbf16, #tpu.memory_space<vmem>>, %arg5: memref<1x128xf32, #tpu.memory_space<vmem>>, %arg6: memref<128x128xbf16, #tpu.memory_space<vmem>>, %arg7: memref<1x128xf32, #tpu.memory_space<vmem>>, %arg8: memref<256x128xbf16, #tpu.memory_space<vmem>>) attributes {dimension_semantics = [#tpu.dimension_semantics<parallel>], iteration_bounds = array<i64: 1>, scalar_prefetch = 0 : i64, scratch_operands = 0 : i64, tpu.core_type = #tpu.core_type<tc>, window_params = [{transform_indices = @transform_0, window_bounds = array<i64: 256, 32>}, {pipeline_mode = #tpu.pipeline_mode<synchronous>, transform_indices = @transform_1, window_bounds = array<i64: 32, 128>}, {pipeline_mode = #tpu.pipeline_mode<synchronous>, transform_indices = @transform_2, window_bounds = array<i64: 1, 128>}, {pipeline_mode = #tpu.pipeline_mode<synchronous>, transform_indices = @transform_3, window_bounds = array<i64: 128, 128>}, {pipeline_mode = #tpu.pipeline_mode<synchronous>, transform_indices = @transform_4, window_bounds = array<i64: 1, 128>}, {pipeline_mode = #tpu.pipeline_mode<synchronous>, transform_indices = @transform_5, window_bounds = array<i64: 128, 128>}, {pipeline_mode = #tpu.pipeline_mode<synchronous>, transform_indices = @transform_6, window_bounds = array<i64: 1, 128>}, {transform_indices = @transform_7, window_bounds = array<i64: 256, 128>}]} {
    %c0 = arith.constant 0 : index
    %c0_0 = arith.constant 0 : index
    %0 = vector.load %arg1[%c0, %c0_0] : memref<256x32xbf16, #tpu.memory_space<vmem>>, vector<256x32xbf16>
    %c0_1 = arith.constant 0 : index
    %c0_2 = arith.constant 0 : index
    %1 = vector.load %arg2[%c0_1, %c0_2] : memref<32x128xbf16, #tpu.memory_space<vmem>>, vector<32x128xbf16>
    %cst = arith.constant dense<0.000000e+00> : vector<256x128xf32>
    %2 = tpu.matmul %0, %1, %cst {dimension_numbers = #tpu.dot_dimension_numbers<[1], [0], [0], [1], [0, 0, 1, 1], [], []>} : vector<256x32xbf16>, vector<32x128xbf16>, vector<256x128xf32> -> vector<256x128xf32>
    %c0_3 = arith.constant 0 : index
    %c0_4 = arith.constant 0 : index
    %3 = vector.load %arg3[%c0_3, %c0_4] : memref<1x128xf32, #tpu.memory_space<vmem>>, vector<1x128xf32>
    %4 = vector.broadcast %3 : vector<1x128xf32> to vector<256x128xf32>
    %5 = arith.addf %2, %4 : vector<256x128xf32>
    %cst_5 = arith.constant 0.000000e+00 : f32
    %6 = vector.broadcast %cst_5 : f32 to vector<256x128xf32>
    %7 = arith.maximumf %5, %6 : vector<256x128xf32>
    %8 = arith.truncf %7 : vector<256x128xf32> to vector<256x128xbf16>
    %c0_6 = arith.constant 0 : index
    %c0_7 = arith.constant 0 : index
    %9 = vector.load %arg4[%c0_6, %c0_7] : memref<128x128xbf16, #tpu.memory_space<vmem>>, vector<128x128xbf16>
    %cst_8 = arith.constant dense<0.000000e+00> : vector<256x128xf32>
    %10 = tpu.matmul %8, %9, %cst_8 {dimension_numbers = #tpu.dot_dimension_numbers<[1], [0], [0], [1], [0, 0, 1, 1], [], []>} : vector<256x128xbf16>, vector<128x128xbf16>, vector<256x128xf32> -> vector<256x128xf32>
    %c0_9 = arith.constant 0 : index
    %c0_10 = arith.constant 0 : index
    %11 = vector.load %arg5[%c0_9, %c0_10] : memref<1x128xf32, #tpu.memory_space<vmem>>, vector<1x128xf32>
    %12 = vector.broadcast %11 : vector<1x128xf32> to vector<256x128xf32>
    %13 = arith.addf %10, %12 : vector<256x128xf32>
    %cst_11 = arith.constant 0.000000e+00 : f32
    %14 = vector.broadcast %cst_11 : f32 to vector<256x128xf32>
    %15 = arith.maximumf %13, %14 : vector<256x128xf32>
    %16 = arith.truncf %15 : vector<256x128xf32> to vector<256x128xbf16>
    %c0_12 = arith.constant 0 : index
    %c0_13 = arith.constant 0 : index
    %17 = vector.load %arg6[%c0_12, %c0_13] : memref<128x128xbf16, #tpu.memory_space<vmem>>, vector<128x128xbf16>
    %cst_14 = arith.constant dense<0.000000e+00> : vector<256x128xf32>
    %18 = tpu.matmul %16, %17, %cst_14 {dimension_numbers = #tpu.dot_dimension_numbers<[1], [0], [0], [1], [0, 0, 1, 1], [], []>} : vector<256x128xbf16>, vector<128x128xbf16>, vector<256x128xf32> -> vector<256x128xf32>
    %c0_15 = arith.constant 0 : index
    %c0_16 = arith.constant 0 : index
    %19 = vector.load %arg7[%c0_15, %c0_16] : memref<1x128xf32, #tpu.memory_space<vmem>>, vector<1x128xf32>
    %20 = vector.broadcast %19 : vector<1x128xf32> to vector<256x128xf32>
    %21 = arith.addf %18, %20 : vector<256x128xf32>
    %22 = arith.truncf %21 : vector<256x128xf32> to vector<256x128xbf16>
    %c0_17 = arith.constant 0 : index
    %c0_18 = arith.constant 0 : index
    %23 = vector.load %arg8[%c0_17, %c0_18] : memref<256x128xbf16, #tpu.memory_space<vmem>>, vector<256x128xbf16>
    tpu.vector_store %arg8[%c0_17, %c0_18], %22 {strides = array<i32>} : memref<256x128xbf16, #tpu.memory_space<vmem>>, vector<256x128xbf16>,
    return
  }
  func.func @transform_0(%arg0: i32) -> (i32, i32) {
    %c0_i32 = arith.constant 0 : i32
    %c0_i32_0 = arith.constant 0 : i32
    return %arg0, %c0_i32 : i32, i32
  }
  func.func @transform_1(%arg0: i32) -> (i32, i32) {
    %c0_i32 = arith.constant 0 : i32
    %c0_i32_0 = arith.constant 0 : i32
    %c0_i32_1 = arith.constant 0 : i32
    return %c0_i32, %c0_i32_0 : i32, i32
  }
  func.func @transform_2(%arg0: i32) -> (i32, i32) {
    %c0_i32 = arith.constant 0 : i32
    %c0_i32_0 = arith.constant 0 : i32
    %c0_i32_1 = arith.constant 0 : i32
    return %c0_i32, %c0_i32_0 : i32, i32
  }
  func.func @transform_3(%arg0: i32) -> (i32, i32) {
    %c0_i32 = arith.constant 0 : i32
    %c0_i32_0 = arith.constant 0 : i32
    %c0_i32_1 = arith.constant 0 : i32
    return %c0_i32, %c0_i32_0 : i32, i32
  }
  func.func @transform_4(%arg0: i32) -> (i32, i32) {
    %c0_i32 = arith.constant 0 : i32
    %c0_i32_0 = arith.constant 0 : i32
    %c0_i32_1 = arith.constant 0 : i32
    return %c0_i32, %c0_i32_0 : i32, i32
  }
  func.func @transform_5(%arg0: i32) -> (i32, i32) {
    %c0_i32 = arith.constant 0 : i32
    %c0_i32_0 = arith.constant 0 : i32
    %c0_i32_1 = arith.constant 0 : i32
    return %c0_i32, %c0_i32_0 : i32, i32
  }
  func.func @transform_6(%arg0: i32) -> (i32, i32) {
    %c0_i32 = arith.constant 0 : i32
    %c0_i32_0 = arith.constant 0 : i32
    %c0_i32_1 = arith.constant 0 : i32
    return %c0_i32, %c0_i32_0 : i32, i32
  }
  func.func @transform_7(%arg0: i32) -> (i32, i32) {
    %c0_i32 = arith.constant 0 : i32
    %c0_i32_0 = arith.constant 0 : i32
    return %arg0, %c0_i32 : i32, i32
  }
}

module attributes {stable_mosaic.version = 11 : i64} {
  func.func @mlp_kernel(%arg0: i32, %arg1: memref<256x32xbf16, #tpu.memory_space<vmem>>, %arg2: memref<32x128xbf16, #tpu.memory_space<vmem>>, %arg3: memref<1x128xf32, #tpu.memory_space<vmem>>, %arg4: memref<128x128xbf16, #tpu.memory_space<vmem>>, %arg5: memref<1x128xf32, #tpu.memory_space<vmem>>, %arg6: memref<128x128xbf16, #tpu.memory_space<vmem>>, %arg7: memref<1x128xf32, #tpu.memory_space<vmem>>, %arg8: memref<256x128xbf16, #tpu.memory_space<vmem>>) attributes {dimension_semantics = [#tpu.dimension_semantics<parallel>], iteration_bounds = array<i64: 1>, scalar_prefetch = 0 : i64, scratch_operands = 0 : i64, tpu.core_type = #tpu.core_type<tc>, window_params = [{transform_indices = @transform_0, window_bounds = array<i64: 256, 32>}, {pipeline_mode = #tpu.pipeline_mode<synchronous>, transform_indices = @transform_1, window_bounds = array<i64: 32, 128>}, {pipeline_mode = #tpu.pipeline_mode<synchronous>, transform_indices = @transform_2, window_bounds = array<i64: 1, 128>}, {pipeline_mode = #tpu.pipeline_mode<synchronous>, transform_indices = @transform_3, window_bounds = array<i64: 128, 128>}, {pipeline_mode = #tpu.pipeline_mode<synchronous>, transform_indices = @transform_4, window_bounds = array<i64: 1, 128>}, {pipeline_mode = #tpu.pipeline_mode<synchronous>, transform_indices = @transform_5, window_bounds = array<i64: 128, 128>}, {pipeline_mode = #tpu.pipeline_mode<synchronous>, transform_indices = @transform_6, window_bounds = array<i64: 1, 128>}, {transform_indices = @transform_7, window_bounds = array<i64: 256, 128>}]} {
    %c0 = arith.constant 0 : index
    %c0_0 = arith.constant 0 : index
    %0 = vector.load %arg1[%c0, %c0_0] : memref<256x32xbf16, #tpu.memory_space<vmem>>, vector<256x32xbf16>
    %c0_1 = arith.constant 0 : index
    %c0_2 = arith.constant 0 : index
    %1 = vector.load %arg2[%c0_1, %c0_2] : memref<32x128xbf16, #tpu.memory_space<vmem>>, vector<32x128xbf16>
    %cst = arith.constant dense<0.000000e+00> : vector<256x128xf32>
    %2 = tpu.matmul %0, %1, %cst {dimension_numbers = #tpu.dot_dimension_numbers<[1], [0], [0], [1], [0, 0, 1, 1], [], []>} : vector<256x32xbf16>, vector<32x128xbf16>, vector<256x128xf32> -> vector<256x128xf32>
    %c0_3 = arith.constant 0 : index
    %c0_4 = arith.constant 0 : index
    %3 = vector.load %arg3[%c0_3, %c0_4] : memref<1x128xf32, #tpu.memory_space<vmem>>, vector<1x128xf32>
    %4 = vector.broadcast %3 : vector<1x128xf32> to vector<256x128xf32>
    %5 = arith.addf %2, %4 : vector<256x128xf32>
    %cst_5 = arith.constant 0.000000e+00 : f32
    %6 = vector.broadcast %cst_5 : f32 to vector<256x128xf32>
    %7 = arith.maximumf %5, %6 : vector<256x128xf32>
    %8 = arith.truncf %7 : vector<256x128xf32> to vector<256x128xbf16>
    %c0_6 = arith.constant 0 : index
    %c0_7 = arith.constant 0 : index
    %9 = vector.load %arg4[%c0_6, %c0_7] : memref<128x128xbf16, #tpu.memory_space<vmem>>, vector<128x128xbf16>
    %cst_8 = arith.constant dense<0.000000e+00> : vector<256x128xf32>
    %10 = tpu.matmul %8, %9, %cst_8 {dimension_numbers = #tpu.dot_dimension_numbers<[1], [0], [0], [1], [0, 0, 1, 1], [], []>} : vector<256x128xbf16>, vector<128x128xbf16>, vector<256x128xf32> -> vector<256x128xf32>
    %c0_9 = arith.constant 0 : index
    %c0_10 = arith.constant 0 : index
    %11 = vector.load %arg5[%c0_9, %c0_10] : memref<1x128xf32, #tpu.memory_space<vmem>>, vector<1x128xf32>
    %12 = vector.broadcast %11 : vector<1x128xf32> to vector<256x128xf32>
    %13 = arith.addf %10, %12 : vector<256x128xf32>
    %cst_11 = arith.constant 0.000000e+00 : f32
    %14 = vector.broadcast %cst_11 : f32 to vector<256x128xf32>
    %15 = arith.maximumf %13, %14 : vector<256x128xf32>
    %16 = arith.truncf %15 : vector<256x128xf32> to vector<256x128xbf16>
    %c0_12 = arith.constant 0 : index
    %c0_13 = arith.constant 0 : index
    %17 = vector.load %arg6[%c0_12, %c0_13] : memref<128x128xbf16, #tpu.memory_space<vmem>>, vector<128x128xbf16>
    %cst_14 = arith.constant dense<0.000000e+00> : vector<256x128xf32>
    %18 = tpu.matmul %16, %17, %cst_14 {dimension_numbers = #tpu.dot_dimension_numbers<[1], [0], [0], [1], [0, 0, 1, 1], [], []>} : vector<256x128xbf16>, vector<128x128xbf16>, vector<256x128xf32> -> vector<256x128xf32>
    %c0_15 = arith.constant 0 : index
    %c0_16 = arith.constant 0 : index
    %19 = vector.load %arg7[%c0_15, %c0_16] : memref<1x128xf32, #tpu.memory_space<vmem>>, vector<1x128xf32>
    %20 = vector.broadcast %19 : vector<1x128xf32> to vector<256x128xf32>
    %21 = arith.addf %18, %20 : vector<256x128xf32>
    %22 = arith.truncf %21 : vector<256x128xf32> to vector<256x128xbf16>
    %c0_17 = arith.constant 0 : index
    %c0_18 = arith.constant 0 : index
    %23 = vector.load %arg8[%c0_17, %c0_18] : memref<256x128xbf16, #tpu.memory_space<vmem>>, vector<256x128xbf16>
    tpu.vector_store %arg8[%c0_17, %c0_18], %22 {strides = array<i32>} : memref<256x128xbf16, #tpu.memory_space<vmem>>, vector<256x128xbf16>,
    return
  }
  func.func @transform_0(%arg0: i32) -> (i32, i32) {
    %c0_i32 = arith.constant 0 : i32
    %c0_i32_0 = arith.constant 0 : i32
    return %arg0, %c0_i32 : i32, i32
  }
  func.func @transform_1(%arg0: i32) -> (i32, i32) {
    %c0_i32 = arith.constant 0 : i32
    %c0_i32_0 = arith.constant 0 : i32
    %c0_i32_1 = arith.constant 0 : i32
    return %c0_i32, %c0_i32_0 : i32, i32
  }
  func.func @transform_2(%arg0: i32) -> (i32, i32) {
    %c0_i32 = arith.constant 0 : i32
    %c0_i32_0 = arith.constant 0 : i32
    %c0_i32_1 = arith.constant 0 : i32
    return %c0_i32, %c0_i32_0 : i32, i32
  }
  func.func @transform_3(%arg0: i32) -> (i32, i32) {
    %c0_i32 = arith.constant 0 : i32
    %c0_i32_0 = arith.constant 0 : i32
    %c0_i32_1 = arith.constant 0 : i32
    return %c0_i32, %c0_i32_0 : i32, i32
  }
  func.func @transform_4(%arg0: i32) -> (i32, i32) {
    %c0_i32 = arith.constant 0 : i32
    %c0_i32_0 = arith.constant 0 : i32
    %c0_i32_1 = arith.constant 0 : i32
    return %c0_i32, %c0_i32_0 : i32, i32
  }
  func.func @transform_5(%arg0: i32) -> (i32, i32) {
    %c0_i32 = arith.constant 0 : i32
    %c0_i32_0 = arith.constant 0 : i32
    %c0_i32_1 = arith.constant 0 : i32
    return %c0_i32, %c0_i32_0 : i32, i32
  }
  func.func @transform_6(%arg0: i32) -> (i32, i32) {
    %c0_i32 = arith.constant 0 : i32
    %c0_i32_0 = arith.constant 0 : i32
    %c0_i32_1 = arith.constant 0 : i32
    return %c0_i32, %c0_i32_0 : i32, i32
  }
  func.func @transform_7(%arg0: i32) -> (i32, i32) {
    %c0_i32 = arith.constant 0 : i32
    %c0_i32_0 = arith.constant 0 : i32
    return %arg0, %c0_i32 : i32, i32
  }
}

</mosaic_0001>

<bundles_post_ra>
// kernel: _forward_impl.1
= control target key start
LH: loop header
LB: loop body
LE: loop exit
PB: predicated region body
PF: predicated region fallthrough
CT: control target
= control target key end

     0   :  { %vm162_vm0 = vcmask 261120   ;;  %s1876_s1 = inlined_call_operand.vmem [shape: bf16[32,128], index: 1, kind: input, shape index: {}]   ;;  %s1877_s0 = inlined_call_operand.vmem [shape: bf16[256,32], index: 0, kind: input, shape index: {}]   ;;  %s1878_s3 = inlined_call_operand.vmem [shape: bf16[128,128], index: 3, kind: input, shape index: {}]   ;;  %s1879_s5 = inlined_call_operand.vmem [shape: bf16[128,128], index: 5, kind: input, shape index: {}]   ;;  %s1880_s2 = inlined_call_operand.vmem [shape: f32[1,128], index: 2, kind: input, shape index: {}]   ;;  %s1881_s4 = inlined_call_operand.vmem [shape: f32[1,128], index: 4, kind: input, shape index: {}]   ;;  %s1882_s6 = inlined_call_operand.vmem [shape: f32[1,128], index: 6, kind: input, shape index: {}]   ;;  %s1883_s7 = inlined_call_operand.vmem [shape: bf16[256,128], index: 7, kind: output, shape index: {}]  }
   0x1   :  { %v1510_v0 = vld [vmem:[%s1876_s1 + $0x8] sm:$0xff]   ;;  %v1511_v1 = vld [vmem:[%s1876_s1] sm:$0xff]   ;;  %v1514_v4 = vld [vmem:[%s1877_s0 + $0x10] sm:$0xff]  }
   0x2   :  { %1374 = vmatprep.subr.bf16.mxu0 %v1510_v0  ;;  %v1512_v2 = vld [vmem:[%s1877_s0] sm:$0xff]   ;;  %1506 = vmatprep.subr.bf16.mxu1 %v1510_v0  ;;  %v1513_v3 = vld [vmem:[%s1877_s0 + $0x8] sm:$0xff]   ;;  %v1522_v7 = vld [vmem:[%s1877_s0 + $0x50] sm:$0xff]  }
   0x3   :  { %1375 = vmatpush3.bf16.msra.mxu0 %v1510_v0  ;;  %1508 = vmatpush3.bf16.msra.mxu1 %v1510_v0  ;;  %v1520_v5 = vld [vmem:[%s1877_s0 + $0x40] sm:$0xff]   ;;  %v1521_v6 = vld [vmem:[%s1877_s0 + $0x48] sm:$0xff]   ;;  %v1515_v8 = vld [vmem:[%s1877_s0 + $0x18] sm:$0xff]  }
   0x4   :  { %1376 = vmatprep.subr.bf16.mxu0 %v1511_v1  ;;  %1378 = vmatprep.mubr.msk.bf16.mxu0 %vm162_vm0, %v1512_v2  ;;  %v1516_v9 = vld [vmem:[%s1877_s0 + $0x20] sm:$0xff]   ;;  %v1523_v10 = vld [vmem:[%s1877_s0 + $0x58] sm:$0xff]   ;;  %v1529_v13 = vld [vmem:[%s1878_s3 + $0x30] sm:$0xff]  }
   0x5   :  { %1507 = vmatprep.subr.bf16.mxu1 %v1511_v1  ;;  %1394 = vmatprep.mubr.msk.bf16.mxu1 %vm162_vm0, %v1520_v5  ;;  %v1524_v11 = vld [vmem:[%s1877_s0 + $0x60] sm:$0xff]   ;;  %v1528_v12 = vld [vmem:[%s1878_s3 + $0x38] sm:$0xff]   ;;  %v1517_v14 = vld [vmem:[%s1877_s0 + $0x28] sm:$0xff]  }
   0x6   :  { %v1518_v15 = vld [vmem:[%s1877_s0 + $0x30] sm:$0xff]   ;;  %v1530_v16 = vld [vmem:[%s1878_s3 + $0x28] sm:$0xff]   ;;  %v1531_v19 = vld [vmem:[%s1878_s3 + $0x20] sm:$0xff]  }
   0x7   :  { %1377 = vmatpush3.bf16.msra.mxu0 %v1511_v1  ;;  %1509 = vmatpush3.bf16.msra.mxu1 %v1511_v1  ;;  %v1525_v17 = vld [vmem:[%s1877_s0 + $0x68] sm:$0xff]   ;;  %v1526_v18 = vld [vmem:[%s1877_s0 + $0x70] sm:$0xff]   ;;  %v1519_v20 = vld [vmem:[%s1877_s0 + $0x38] sm:$0xff]  }
   0x8   :  { %1410 = vmatprep.subr.bf16.mxu1 %v1528_v12  ;;  %v1532_v21 = vld [vmem:[%s1878_s3 + $0x18] sm:$0xff]   ;;  %v1533_v23 = vld [vmem:[%s1878_s3 + $0x10] sm:$0xff]   ;;  %v1534_v24 = vld [vmem:[%s1878_s3 + $0x8] sm:$0xff]  }
   0x9   :  { %v1527_v22 = vld [vmem:[%s1877_s0 + $0x78] sm:$0xff]   ;;  %v1535_v25 = vld [vmem:[%s1878_s3] sm:$0xff]   ;;  %v1537_v27 = vld [vmem:[%s1879_s5 + $0x30] sm:$0xff]  }
   0xa   :  { %1379 = vmatmul.mubr.msk.bf16.vlgmr.msra.gmra.mxu0 %vm162_vm0, %v1513_v3  ;;  %1395 = vmatmul.mubr.msk.bf16.vlgmr.msra.gmra.mxu1 %vm162_vm0, %v1521_v6  ;;  %v1536_v26 = vld [vmem:[%s1879_s5 + $0x38] sm:$0xff]   ;;  %v1538_v28 = vld [vmem:[%s1879_s5 + $0x28] sm:$0xff]   ;;  %v1539_v29 = vld [vmem:[%s1879_s5 + $0x20] sm:$0xff]  }
   0xb   :  { %1382 = vmatprep.mubr.msk.bf16.mxu0 %vm162_vm0, %v1514_v4  ;;  %1398 = vmatprep.mubr.msk.bf16.mxu1 %vm162_vm0, %v1522_v7  ;;  %v1540_v30 = vld [vmem:[%s1879_s5 + $0x18] sm:$0xff]   ;;  %v1696_v33 = vld [vmem:[%s1880_s2] ss:$0 sm:$0xff] }
   0xc   :  { %1411 = vmatpush3.bf16.msra.mxu1 %v1528_v12  ;;  %1458 = vmatprep.subr.bf16.mxu0 %v1536_v26 }
   0xd   :  { %1412 = vmatprep.subr.bf16.mxu1 %v1529_v13  ;;  %1459 = vmatpush3.bf16.msra.mxu0 %v1536_v26 }
   0xe   :  { %1460 = vmatprep.subr.bf16.mxu0 %v1537_v27 }
  0x10   :  { %1413 = vmatpush3.bf16.msra.mxu1 %v1529_v13 }
  0x11   :  { %1414 = vmatprep.subr.bf16.mxu1 %v1530_v16  ;;  %1461 = vmatpush3.bf16.msra.mxu0 %v1537_v27 }
  0x12   :  { %1383 = vmatmul.mubr.msk.bf16.gmra.mxu0 %vm162_vm0, %v1515_v8  ;;  %1399 = vmatmul.mubr.msk.bf16.gmra.mxu1 %vm162_vm0, %v1523_v10 }
  0x13   :  { %1386 = vmatprep.mubr.msk.bf16.mxu0 %vm162_vm0, %v1516_v9  ;;  %1402 = vmatprep.mubr.msk.bf16.mxu1 %vm162_vm0, %v1524_v11 }
  0x14   :  { %1415 = vmatpush3.bf16.msra.mxu1 %v1530_v16  ;;  %1462 = vmatprep.subr.bf16.mxu0 %v1538_v28 }
  0x15   :  { %1416 = vmatprep.subr.bf16.mxu1 %v1531_v19  ;;  %1463 = vmatpush3.bf16.msra.mxu0 %v1538_v28 }
  0x16   :  { %1464 = vmatprep.subr.bf16.mxu0 %v1539_v29 }
  0x18   :  { %1417 = vmatpush3.bf16.msra.mxu1 %v1531_v19 }
  0x19   :  { %1418 = vmatprep.subr.bf16.mxu1 %v1532_v21  ;;  %1465 = vmatpush3.bf16.msra.mxu0 %v1539_v29 }
  0x1a   :  { %1387 = vmatmul.mubr.msk.bf16.gmra.mxu0 %vm162_vm0, %v1517_v14  ;;  %1403 = vmatmul.mubr.msk.bf16.gmra.mxu1 %vm162_vm0, %v1525_v17 }
  0x1b   :  { %1390 = vmatprep.mubr.msk.bf16.mxu0 %vm162_vm0, %v1518_v15  ;;  %1406 = vmatprep.mubr.msk.bf16.mxu1 %vm162_vm0, %v1526_v18 }
  0x1c   :  { %1419 = vmatpush3.bf16.msra.mxu1 %v1532_v21  ;;  %1466 = vmatprep.subr.bf16.mxu0 %v1540_v30 }
  0x1d   :  { %1420 = vmatprep.subr.bf16.mxu1 %v1533_v23  ;;  %1467 = vmatpush3.bf16.msra.mxu0 %v1540_v30 }
  0x20   :  { %1421 = vmatpush3.bf16.msra.mxu1 %v1533_v23 }
  0x21   :  { %1422 = vmatprep.subr.bf16.mxu1 %v1534_v24 }
  0x22   :  { %1391 = vmatmul.mubr.msk.bf16.gmra.mxu0 %vm162_vm0, %v1519_v20  ;;  %1407 = vmatmul.mubr.msk.bf16.gmra.mxu1 %vm162_vm0, %v1527_v22 }
  0x24   :  { %1423 = vmatpush3.bf16.msra.mxu1 %v1534_v24 }
  0x25   :  { %1424 = vmatprep.subr.bf16.mxu1 %v1535_v25 }
  0x28   :  { %1425 = vmatpush3.bf16.msra.mxu1 %v1535_v25 }
  0xca   :  { %v1380_v31 = vpop.f32.mrf.mxu0  ;;  %v1698_v34 = vpop.f32.mrf.mxu1 }
  0xcb   :  { %v254_v39 = vadd.f32 %v1380_v31, %v1696_v33 }
  0xcc   :  { %v245_v32 = vpop.f32.mrf.mxu0  ;;  %v309_v38 = vpop.f32.mrf.mxu1 }
  0xcd   :  { %v246_v36 = vadd.f32 %v1696_v33, %v245_v32  ;;  %v374_v48 = vmax.f32 %v254_v39, 0.0  ;;  %v310_v21 = vadd.f32 %v1696_v33, %v309_v38 }
  0xce   :  { %v1381_v35 = vpop.f32.mrf.mxu0  ;;  %v1704_v42 = vpop.f32.mrf.mxu1 }
  0xcf   :  { %v257_v37 = vadd.f32 %v1381_v35, %v1696_v33  ;;  %v372_v45 = vmax.f32 %v246_v36, 0.0  ;;  %v388_v30 = vmax.f32 %v310_v21, 0.0  ;;  %v1757_v21 = vld [vmem:[%s1881_s4] ss:$0 sm:$0xff] }
  0xd0   :  { %v248_v40 = vpop.f32.mrf.mxu0  ;;  %v312_v47 = vpop.f32.mrf.mxu1 }
  0xd1   :  { %v249_v41 = vadd.f32 %v1696_v33, %v248_v40  ;;  %v375_v43 = vmax.f32 %v257_v37, 0.0  ;;  %v313_v22 = vadd.f32 %v1696_v33, %v312_v47  ;;  %v321_v47 = vadd.f32 %v1704_v42, %v1696_v33 }
  0xd2   :  { %v1384_v44 = vpop.f32.mrf.mxu0  ;;  %v1706_v51 = vpop.f32.mrf.mxu1 }
  0xd3   :  { %v373_v46 = vmax.f32 %v249_v41, 0.0  ;;  %v405_v52 = vpack.c.bf16 %v375_v43, %v374_v48  ;;  %v270_v57 = vadd.f32 %v1384_v44, %v1696_v33  ;;  %v389_v32 = vmax.f32 %v313_v22, 0.0 }
  0xd4   :  { %v261_v49 = vpop.f32.mrf.mxu0  ;;  %v325_v56 = vpop.f32.mrf.mxu1 }
  0xd5   :  { %v404_v50 = vpack.c.bf16 %v373_v46, %v372_v45  ;;  %v262_v54 = vadd.f32 %v1696_v33, %v261_v49  ;;  %v378_v2 = vmax.f32 %v270_v57, 0.0  ;;  %v412_v41 = vpack.c.bf16 %v389_v32, %v388_v30 }
  0xd6   :  { %v1385_v53 = vpop.f32.mrf.mxu0  ;;  %v1712_v60 = vpop.f32.mrf.mxu1  ;;  %v326_v43 = vadd.f32 %v1696_v33, %v325_v56  ;;  %v318_v45 = vadd.f32 %v1698_v34, %v1696_v33  ;;  %v334_v34 = vadd.f32 %v1706_v51, %v1696_v33 }
  0xd7   :  { %v273_v55 = vadd.f32 %v1385_v53, %v1696_v33  ;;  %1426 = vmatprep.mubr.bf16.mxu1 %v404_v50  ;;  %v376_v63 = vmax.f32 %v262_v54, 0.0  ;;  %v391_v53 = vmax.f32 %v321_v47, 0.0  ;;  %v337_v42 = vadd.f32 %v1712_v60, %v1696_v33 }
  0xd8   :  { %v264_v58 = vpop.f32.mrf.mxu0  ;;  %1427 = vmatmul.mubr.bf16.vlgmr.msra.gmra.mxu1 %v405_v52  ;;  %v328_v1 = vpop.f32.mrf.mxu1  ;;  %v392_v49 = vmax.f32 %v326_v43, 0.0  ;;  %v390_v52 = vmax.f32 %v318_v45, 0.0 }
  0xd9   :  { %v265_v59 = vadd.f32 %v1696_v33, %v264_v58  ;;  %v379_v61 = vmax.f32 %v273_v55, 0.0  ;;  %v329_v44 = vadd.f32 %v1696_v33, %v328_v1 }
  0xda   :  { %v1388_v62 = vpop.f32.mrf.mxu0  ;;  %v1714_v7 = vpop.f32.mrf.mxu1  ;;  %v413_v58 = vpack.c.bf16 %v391_v53, %v390_v52 }
  0xdb   :  { %v377_v0 = vmax.f32 %v265_v59, 0.0  ;;  %v407_v5 = vpack.c.bf16 %v379_v61, %v378_v2  ;;  %v286_v10 = vadd.f32 %v1388_v62, %v1696_v33  ;;  %v393_v50 = vmax.f32 %v329_v44, 0.0 }
  0xdc   :  { %v277_v3 = vpop.f32.mrf.mxu0  ;;  %v341_v15 = vpop.f32.mrf.mxu1  ;;  %v350_v51 = vadd.f32 %v1714_v7, %v1696_v33  ;;  %v1541_v7 = vld [vmem:[%s1879_s5 + $0x10] sm:$0xff]  }
  0xdd   :  { %v406_v4 = vpack.c.bf16 %v377_v0, %v376_v63  ;;  %v278_v8 = vadd.f32 %v1696_v33, %v277_v3  ;;  %v382_v18 = vmax.f32 %v286_v10, 0.0  ;;  %v414_v55 = vpack.c.bf16 %v393_v50, %v392_v49  ;;  %1468 = vmatprep.subr.bf16.mxu0 %v1541_v7 }
  0xde   :  { %v1389_v6 = vpop.f32.mrf.mxu0  ;;  %v1405_v25 = vpop.f32.mrf.mxu1  ;;  %v342_v56 = vadd.f32 %v1696_v33, %v341_v15  ;;  %v394_v63 = vmax.f32 %v334_v34, 0.0  ;;  %v395_v0 = vmax.f32 %v337_v42, 0.0  ;;  %1469 = vmatpush3.bf16.msra.mxu0 %v1541_v7 }
  0xdf   :  { %v289_v9 = vadd.f32 %v1389_v6, %v1696_v33  ;;  %1430 = vmatprep.mubr.bf16.mxu1 %v406_v4  ;;  %v380_v16 = vmax.f32 %v278_v8, 0.0  ;;  %v353_v6 = vadd.f32 %v1405_v25, %v1696_v33 }
  0xe0   :  { %v280_v11 = vpop.f32.mrf.mxu0  ;;  %1431 = vmatmul.mubr.bf16.gmra.mxu1 %v407_v5  ;;  %v344_v36 = vpop.f32.mrf.mxu1  ;;  %v396_v61 = vmax.f32 %v342_v56, 0.0  ;;  %v415_v5 = vpack.c.bf16 %v395_v0, %v394_v63 }
  0xe1   :  { %v281_v12 = vadd.f32 %v1696_v33, %v280_v11  ;;  %v383_v13 = vmax.f32 %v289_v9, 0.0  ;;  %v345_v57 = vadd.f32 %v1696_v33, %v344_v36  ;;  %v398_v9 = vmax.f32 %v350_v51, 0.0 }
  0xe2   :  { %v1392_v14 = vpop.f32.mrf.mxu0  ;;  %v1408_v48 = vpop.f32.mrf.mxu1  ;;  %v399_v10 = vmax.f32 %v353_v6, 0.0 }
  0xe3   :  { %v381_v17 = vmax.f32 %v281_v12, 0.0  ;;  %v409_v23 = vpack.c.bf16 %v383_v13, %v382_v18  ;;  %v302_v28 = vadd.f32 %v1392_v14, %v1696_v33  ;;  %v397_v62 = vmax.f32 %v345_v57, 0.0  ;;  %v1542_v18 = vld [vmem:[%s1879_s5 + $0x8] sm:$0xff]  }
  0xe4   :  { %v293_v19 = vpop.f32.mrf.mxu0  ;;  %v357_v54 = vpop.f32.mrf.mxu1  ;;  %v417_v12 = vpack.c.bf16 %v399_v10, %v398_v9  ;;  %v366_v13 = vadd.f32 %v1408_v48, %v1696_v33  ;;  %1470 = vmatprep.subr.bf16.mxu0 %v1542_v18 }
  0xe5   :  { %v408_v20 = vpack.c.bf16 %v381_v17, %v380_v16  ;;  %v294_v26 = vadd.f32 %v1696_v33, %v293_v19  ;;  %v386_v39 = vmax.f32 %v302_v28, 0.0  ;;  %v416_v2 = vpack.c.bf16 %v397_v62, %v396_v61  ;;  %1471 = vmatpush3.bf16.msra.mxu0 %v1542_v18 }
  0xe6   :  { %v1393_v24 = vpop.f32.mrf.mxu0  ;;  %v1409_v59 = vpop.f32.mrf.mxu1  ;;  %v358_v3 = vadd.f32 %v1696_v33, %v357_v54  ;;  %v402_v15 = vmax.f32 %v366_v13, 0.0 }
  0xe7   :  { %v305_v27 = vadd.f32 %v1393_v24, %v1696_v33  ;;  %1434 = vmatprep.mubr.bf16.mxu1 %v408_v20  ;;  %v384_v37 = vmax.f32 %v294_v26, 0.0  ;;  %v369_v14 = vadd.f32 %v1409_v59, %v1696_v33 }
  0xe8   :  { %v296_v29 = vpop.f32.mrf.mxu0  ;;  %1435 = vmatmul.mubr.bf16.gmra.mxu1 %v409_v23  ;;  %v360_v1 = vpop.f32.mrf.mxu1  ;;  %v400_v60 = vmax.f32 %v358_v3, 0.0 }
  0xe9   :  { %v297_v31 = vadd.f32 %v1696_v33, %v296_v29  ;;  %v387_v35 = vmax.f32 %v305_v27, 0.0  ;;  %v361_v4 = vadd.f32 %v1696_v33, %v360_v1  ;;  %v403_v16 = vmax.f32 %v369_v14, 0.0  ;;  %v1543_v33 = vld [vmem:[%s1879_s5] sm:$0xff]  }
  0xea   :  { %1472 = vmatprep.subr.bf16.mxu0 %v1543_v33 }
  0xeb   :  { %v385_v38 = vmax.f32 %v297_v31, 0.0  ;;  %v411_v46 = vpack.c.bf16 %v387_v35, %v386_v39  ;;  %v401_v8 = vmax.f32 %v361_v4, 0.0  ;;  %v419_v17 = vpack.c.bf16 %v403_v16, %v402_v15  ;;  %1473 = vmatpush3.bf16.msra.mxu0 %v1543_v33 }
  0xed   :  { %v410_v40 = vpack.c.bf16 %v385_v38, %v384_v37  ;;  %v418_v11 = vpack.c.bf16 %v401_v8, %v400_v60 }
  0xef   :  { %1438 = vmatprep.mubr.bf16.mxu1 %v410_v40 }
  0xf0   :  { %1439 = vmatmul.mubr.bf16.gmra.mxu1 %v411_v46 }
  0xf1   :  { %1442 = vmatprep.mubr.bf16.mxu1 %v412_v41 }
  0xf8   :  { %1443 = vmatmul.mubr.bf16.gmra.mxu1 %v413_v58 }
  0xf9   :  { %1446 = vmatprep.mubr.bf16.mxu1 %v414_v55 }
 0x100   :  { %1447 = vmatmul.mubr.bf16.gmra.mxu1 %v415_v5 }
 0x101   :  { %1450 = vmatprep.mubr.bf16.mxu1 %v416_v2 }
 0x108   :  { %1451 = vmatmul.mubr.bf16.gmra.mxu1 %v417_v12 }
 0x109   :  { %1454 = vmatprep.mubr.bf16.mxu1 %v418_v11 }
 0x110   :  { %1455 = vmatmul.mubr.bf16.gmra.mxu1 %v419_v17 }
 0x198   :  { %v1428_v19 = vpop.f32.mrf.mxu1 }
 0x199   :  { %v534_v25 = vadd.f32 %v1428_v19, %v1757_v21 }
 0x19a   :  { %v525_v20 = vpop.f32.mrf.mxu1 }
 0x19b   :  { %v526_v23 = vadd.f32 %v1757_v21, %v525_v20  ;;  %v654_v32 = vmax.f32 %v534_v25, 0.0 }
 0x19c   :  { %v1429_v22 = vpop.f32.mrf.mxu1 }
 0x19d   :  { %v537_v24 = vadd.f32 %v1429_v22, %v1757_v21  ;;  %v652_v30 = vmax.f32 %v526_v23, 0.0 }
 0x19e   :  { %v528_v26 = vpop.f32.mrf.mxu1 }
 0x19f   :  { %v529_v27 = vadd.f32 %v1757_v21, %v528_v26  ;;  %v655_v28 = vmax.f32 %v537_v24, 0.0 }
 0x1a0   :  { %v1432_v29 = vpop.f32.mrf.mxu1 }
 0x1a1   :  { %v653_v31 = vmax.f32 %v529_v27, 0.0  ;;  %v685_v37 = vpack.c.bf16 %v655_v28, %v654_v32  ;;  %v550_v41 = vadd.f32 %v1432_v29, %v1757_v21 }
 0x1a2   :  { %v541_v35 = vpop.f32.mrf.mxu1 }
 0x1a3   :  { %v684_v36 = vpack.c.bf16 %v653_v31, %v652_v30  ;;  %v542_v39 = vadd.f32 %v1757_v21, %v541_v35  ;;  %v658_v49 = vmax.f32 %v550_v41, 0.0 }
 0x1a4   :  { %v1433_v38 = vpop.f32.mrf.mxu1 }
 0x1a5   :  { %v553_v40 = vadd.f32 %v1433_v38, %v1757_v21  ;;  %1474 = vmatprep.mubr.bf16.mxu0 %v684_v36  ;;  %v656_v47 = vmax.f32 %v542_v39, 0.0 }
 0x1a6   :  { %v544_v43 = vpop.f32.mrf.mxu1  ;;  %1475 = vmatmul.mubr.bf16.vlgmr.msra.gmra.mxu0 %v685_v37 }
 0x1a7   :  { %v545_v44 = vadd.f32 %v1757_v21, %v544_v43  ;;  %v659_v45 = vmax.f32 %v553_v40, 0.0 }
 0x1a8   :  { %v1436_v46 = vpop.f32.mrf.mxu1 }
 0x1a9   :  { %v657_v48 = vmax.f32 %v545_v44, 0.0  ;;  %v687_v53 = vpack.c.bf16 %v659_v45, %v658_v49  ;;  %v566_v57 = vadd.f32 %v1436_v46, %v1757_v21 }
 0x1aa   :  { %v557_v50 = vpop.f32.mrf.mxu1 }
 0x1ab   :  { %v686_v52 = vpack.c.bf16 %v657_v48, %v656_v47  ;;  %v558_v55 = vadd.f32 %v1757_v21, %v557_v50  ;;  %v662_v63 = vmax.f32 %v566_v57, 0.0 }
 0x1ac   :  { %v1437_v54 = vpop.f32.mrf.mxu1 }
 0x1ad   :  { %v569_v56 = vadd.f32 %v1437_v54, %v1757_v21  ;;  %1478 = vmatprep.mubr.bf16.mxu0 %v686_v52  ;;  %v660_v61 = vmax.f32 %v558_v55, 0.0 }
 0x1ae   :  { %v560_v58 = vpop.f32.mrf.mxu1  ;;  %1479 = vmatmul.mubr.bf16.gmra.mxu0 %v687_v53 }
 0x1af   :  { %v561_v34 = vadd.f32 %v1757_v21, %v560_v58  ;;  %v663_v42 = vmax.f32 %v569_v56, 0.0 }
 0x1b0   :  { %v1440_v59 = vpop.f32.mrf.mxu1 }
 0x1b1   :  { %v661_v62 = vmax.f32 %v561_v34, 0.0  ;;  %v689_v2 = vpack.c.bf16 %v663_v42, %v662_v63  ;;  %v582_v51 = vadd.f32 %v1440_v59, %v1757_v21 }
 0x1b2   :  { %v573_v0 = vpop.f32.mrf.mxu1 }
 0x1b3   :  { %v688_v1 = vpack.c.bf16 %v661_v62, %v660_v61  ;;  %v574_v4 = vadd.f32 %v1757_v21, %v573_v0  ;;  %v666_v12 = vmax.f32 %v582_v51, 0.0 }
 0x1b4   :  { %v1441_v3 = vpop.f32.mrf.mxu1 }
 0x1b5   :  { %v585_v5 = vadd.f32 %v1441_v3, %v1757_v21  ;;  %1482 = vmatprep.mubr.bf16.mxu0 %v688_v1  ;;  %v664_v10 = vmax.f32 %v574_v4, 0.0 }
 0x1b6   :  { %v576_v6 = vpop.f32.mrf.mxu1  ;;  %1483 = vmatmul.mubr.bf16.gmra.mxu0 %v689_v2 }
 0x1b7   :  { %v577_v60 = vadd.f32 %v1757_v21, %v576_v6  ;;  %v667_v8 = vmax.f32 %v585_v5, 0.0 }
 0x1b8   :  { %v1444_v9 = vpop.f32.mrf.mxu1 }
 0x1b9   :  { %v665_v11 = vmax.f32 %v577_v60, 0.0  ;;  %v691_v15 = vpack.c.bf16 %v667_v8, %v666_v12  ;;  %v598_v18 = vadd.f32 %v1444_v9, %v1757_v21  ;;  %v1794_v8 = vld [vmem:[%s1882_s6] ss:$0 sm:$0xff] }
 0x1ba   :  { %v589_v13 = vpop.f32.mrf.mxu1 }
 0x1bb   :  { %v690_v14 = vpack.c.bf16 %v665_v11, %v664_v10  ;;  %v590_v17 = vadd.f32 %v1757_v21, %v589_v13  ;;  %v670_v25 = vmax.f32 %v598_v18, 0.0 }
 0x1bc   :  { %v1445_v16 = vpop.f32.mrf.mxu1 }
 0x1bd   :  { %v601_v7 = vadd.f32 %v1445_v16, %v1757_v21  ;;  %1486 = vmatprep.mubr.bf16.mxu0 %v690_v14  ;;  %v668_v23 = vmax.f32 %v590_v17, 0.0 }
 0x1be   :  { %v592_v33 = vpop.f32.mrf.mxu1  ;;  %1487 = vmatmul.mubr.bf16.gmra.mxu0 %v691_v15 }
 0x1bf   :  { %v593_v19 = vadd.f32 %v1757_v21, %v592_v33  ;;  %v671_v20 = vmax.f32 %v601_v7, 0.0 }
 0x1c0   :  { %v1448_v22 = vpop.f32.mrf.mxu1 }
 0x1c1   :  { %v669_v24 = vmax.f32 %v593_v19, 0.0  ;;  %v693_v28 = vpack.c.bf16 %v671_v20, %v670_v25  ;;  %v614_v32 = vadd.f32 %v1448_v22, %v1757_v21 }
 0x1c2   :  { %v605_v26 = vpop.f32.mrf.mxu1 }
 0x1c3   :  { %v692_v27 = vpack.c.bf16 %v669_v24, %v668_v23  ;;  %v606_v30 = vadd.f32 %v1757_v21, %v605_v26  ;;  %v674_v41 = vmax.f32 %v614_v32, 0.0 }
 0x1c4   :  { %v1449_v29 = vpop.f32.mrf.mxu1 }
 0x1c5   :  { %v617_v31 = vadd.f32 %v1449_v29, %v1757_v21  ;;  %1490 = vmatprep.mubr.bf16.mxu0 %v692_v27  ;;  %v672_v39 = vmax.f32 %v606_v30, 0.0 }
 0x1c6   :  { %v608_v35 = vpop.f32.mrf.mxu1  ;;  %1491 = vmatmul.mubr.bf16.gmra.mxu0 %v693_v28 }
 0x1c7   :  { %v609_v36 = vadd.f32 %v1757_v21, %v608_v35  ;;  %v675_v37 = vmax.f32 %v617_v31, 0.0 }
 0x1c8   :  { %v1452_v38 = vpop.f32.mrf.mxu1 }
 0x1c9   :  { %v673_v40 = vmax.f32 %v609_v36, 0.0  ;;  %v695_v45 = vpack.c.bf16 %v675_v37, %v674_v41  ;;  %v630_v49 = vadd.f32 %v1452_v38, %v1757_v21 }
 0x1ca   :  { %v621_v43 = vpop.f32.mrf.mxu1 }
 0x1cb   :  { %v694_v44 = vpack.c.bf16 %v673_v40, %v672_v39  ;;  %v622_v47 = vadd.f32 %v1757_v21, %v621_v43  ;;  %v678_v57 = vmax.f32 %v630_v49, 0.0 }
 0x1cc   :  { %v1453_v46 = vpop.f32.mrf.mxu1 }
 0x1cd   :  { %v633_v48 = vadd.f32 %v1453_v46, %v1757_v21  ;;  %1494 = vmatprep.mubr.bf16.mxu0 %v694_v44  ;;  %v676_v55 = vmax.f32 %v622_v47, 0.0 }
 0x1ce   :  { %v624_v50 = vpop.f32.mrf.mxu1  ;;  %1495 = vmatmul.mubr.bf16.gmra.mxu0 %v695_v45 }
 0x1cf   :  { %v625_v52 = vadd.f32 %v1757_v21, %v624_v50  ;;  %v679_v53 = vmax.f32 %v633_v48, 0.0 }
 0x1d0   :  { %v1456_v54 = vpop.f32.mrf.mxu1 }
 0x1d1   :  { %v677_v56 = vmax.f32 %v625_v52, 0.0  ;;  %v697_v42 = vpack.c.bf16 %v679_v53, %v678_v57  ;;  %v646_v63 = vadd.f32 %v1456_v54, %v1757_v21 }
 0x1d2   :  { %v637_v58 = vpop.f32.mrf.mxu1 }
 0x1d3   :  { %v696_v34 = vpack.c.bf16 %v677_v56, %v676_v55  ;;  %v638_v61 = vadd.f32 %v1757_v21, %v637_v58  ;;  %v682_v5 = vmax.f32 %v646_v63, 0.0 }
 0x1d4   :  { %v1457_v59 = vpop.f32.mrf.mxu1 }
 0x1d5   :  { %v649_v62 = vadd.f32 %v1457_v59, %v1757_v21  ;;  %1498 = vmatprep.mubr.bf16.mxu0 %v696_v34  ;;  %v680_v3 = vmax.f32 %v638_v61, 0.0 }
 0x1d6   :  { %v640_v0 = vpop.f32.mrf.mxu1  ;;  %1499 = vmatmul.mubr.bf16.gmra.mxu0 %v697_v42 }
 0x1d7   :  { %v641_v1 = vadd.f32 %v1757_v21, %v640_v0  ;;  %v683_v2 = vmax.f32 %v649_v62, 0.0 }
 0x1d9   :  { %v681_v4 = vmax.f32 %v641_v1, 0.0  ;;  %v699_v6 = vpack.c.bf16 %v683_v2, %v682_v5 }
 0x1db   :  { %v698_v51 = vpack.c.bf16 %v681_v4, %v680_v3 }
 0x1dd   :  { %1502 = vmatprep.mubr.bf16.mxu0 %v698_v51 }
 0x1de   :  { %1503 = vmatmul.mubr.bf16.gmra.mxu0 %v699_v6 }
 0x266   :  { %v1476_v60 = vpop.f32.mrf.mxu0 }
 0x267   :  { %v814_v11 = vadd.f32 %v1476_v60, %v1794_v8 }
 0x268   :  { %v805_v9 = vpop.f32.mrf.mxu0 }
 0x269   :  { %v806_v13 = vadd.f32 %v1794_v8, %v805_v9 }
 0x26a   :  { %v1477_v10 = vpop.f32.mrf.mxu0 }
 0x26b   :  { %v817_v21 = vadd.f32 %v1477_v10, %v1794_v8 }
 0x26c   :  { %v808_v12 = vpop.f32.mrf.mxu0 }
 0x26d   :  { %v1221_v14 = vpack.c.bf16 %v817_v21, %v814_v11  ;;  %v809_v15 = vadd.f32 %v1794_v8, %v808_v12 }
 0x26e   :  { %v1480_v16 = vpop.f32.mrf.mxu0 }
 0x26f   :  { %1293 = vst [vmem:[%s1883_s7 + $0x8] sm:$0xff] %v1221_v14   ;;  %v1216_v17 = vpack.c.bf16 %v809_v15, %v806_v13  ;;  %v830_v33 = vadd.f32 %v1480_v16, %v1794_v8 }
 0x270   :  { %v821_v7 = vpop.f32.mrf.mxu0 }
 0x271   :  { %1217 = vst [vmem:[%s1883_s7] sm:$0xff] %v1216_v17   ;;  %v822_v22 = vadd.f32 %v1794_v8, %v821_v7 }
 0x272   :  { %v1481_v18 = vpop.f32.mrf.mxu0 }
 0x273   :  { %v833_v19 = vadd.f32 %v1481_v18, %v1794_v8 }
 0x274   :  { %v824_v20 = vpop.f32.mrf.mxu0 }
 0x275   :  { %v1231_v23 = vpack.c.bf16 %v833_v19, %v830_v33  ;;  %v825_v24 = vadd.f32 %v1794_v8, %v824_v20 }
 0x276   :  { %v1484_v25 = vpop.f32.mrf.mxu0 }
 0x277   :  { %1295 = vst [vmem:[%s1883_s7 + $0x18] sm:$0xff] %v1231_v23   ;;  %v1226_v26 = vpack.c.bf16 %v825_v24, %v822_v22  ;;  %v846_v29 = vadd.f32 %v1484_v25, %v1794_v8 }
 0x278   :  { %v837_v27 = vpop.f32.mrf.mxu0 }
 0x279   :  { %1294 = vst [vmem:[%s1883_s7 + $0x10] sm:$0xff] %v1226_v26   ;;  %v838_v32 = vadd.f32 %v1794_v8, %v837_v27 }
 0x27a   :  { %v1485_v28 = vpop.f32.mrf.mxu0 }
 0x27b   :  { %v849_v30 = vadd.f32 %v1485_v28, %v1794_v8 }
 0x27c   :  { %v840_v31 = vpop.f32.mrf.mxu0 }
 0x27d   :  { %v1241_v35 = vpack.c.bf16 %v849_v30, %v846_v29  ;;  %v841_v36 = vadd.f32 %v1794_v8, %v840_v31 }
 0x27e   :  { %v1488_v37 = vpop.f32.mrf.mxu0 }
 0x27f   :  { %1297 = vst [vmem:[%s1883_s7 + $0x28] sm:$0xff] %v1241_v35   ;;  %v1236_v38 = vpack.c.bf16 %v841_v36, %v838_v32  ;;  %v862_v41 = vadd.f32 %v1488_v37, %v1794_v8 }
 0x280   :  { %v853_v39 = vpop.f32.mrf.mxu0 }
 0x281   :  { %1296 = vst [vmem:[%s1883_s7 + $0x20] sm:$0xff] %v1236_v38   ;;  %v854_v45 = vadd.f32 %v1794_v8, %v853_v39 }
 0x282   :  { %v1489_v40 = vpop.f32.mrf.mxu0 }
 0x283   :  { %v865_v43 = vadd.f32 %v1489_v40, %v1794_v8 }
 0x284   :  { %v856_v44 = vpop.f32.mrf.mxu0 }
 0x285   :  { %v1251_v46 = vpack.c.bf16 %v865_v43, %v862_v41  ;;  %v857_v47 = vadd.f32 %v1794_v8, %v856_v44 }
 0x286   :  { %v1492_v48 = vpop.f32.mrf.mxu0 }
 0x287   :  { %1299 = vst [vmem:[%s1883_s7 + $0x38] sm:$0xff] %v1251_v46   ;;  %v1246_v49 = vpack.c.bf16 %v857_v47, %v854_v45  ;;  %v878_v53 = vadd.f32 %v1492_v48, %v1794_v8 }
 0x288   :  { %v869_v50 = vpop.f32.mrf.mxu0 }
 0x289   :  { %1298 = vst [vmem:[%s1883_s7 + $0x30] sm:$0xff] %v1246_v49   ;;  %v870_v56 = vadd.f32 %v1794_v8, %v869_v50 }
 0x28a   :  { %v1493_v52 = vpop.f32.mrf.mxu0 }
 0x28b   :  { %v881_v54 = vadd.f32 %v1493_v52, %v1794_v8 }
 0x28c   :  { %v872_v55 = vpop.f32.mrf.mxu0 }
 0x28d   :  { %v1261_v57 = vpack.c.bf16 %v881_v54, %v878_v53  ;;  %v873_v58 = vadd.f32 %v1794_v8, %v872_v55 }
 0x28e   :  { %v1496_v34 = vpop.f32.mrf.mxu0 }
 0x28f   :  { %1301 = vst [vmem:[%s1883_s7 + $0x48] sm:$0xff] %v1261_v57   ;;  %v1256_v42 = vpack.c.bf16 %v873_v58, %v870_v56  ;;  %v894_v62 = vadd.f32 %v1496_v34, %v1794_v8 }
 0x290   :  { %v885_v59 = vpop.f32.mrf.mxu0 }
 0x291   :  { %1300 = vst [vmem:[%s1883_s7 + $0x40] sm:$0xff] %v1256_v42   ;;  %v886_v1 = vadd.f32 %v1794_v8, %v885_v59 }
 0x292   :  { %v1497_v61 = vpop.f32.mrf.mxu0 }
 0x293   :  { %v897_v63 = vadd.f32 %v1497_v61, %v1794_v8 }
 0x294   :  { %v888_v0 = vpop.f32.mrf.mxu0 }
 0x295   :  { %v1271_v2 = vpack.c.bf16 %v897_v63, %v894_v62  ;;  %v889_v3 = vadd.f32 %v1794_v8, %v888_v0 }
 0x296   :  { %v1500_v4 = vpop.f32.mrf.mxu0 }
 0x297   :  { %1303 = vst [vmem:[%s1883_s7 + $0x58] sm:$0xff] %v1271_v2   ;;  %v1266_v5 = vpack.c.bf16 %v889_v3, %v886_v1  ;;  %v910_v60 = vadd.f32 %v1500_v4, %v1794_v8 }
 0x298   :  { %v901_v51 = vpop.f32.mrf.mxu0 }
 0x299   :  { %1302 = vst [vmem:[%s1883_s7 + $0x50] sm:$0xff] %v1266_v5   ;;  %v902_v11 = vadd.f32 %v1794_v8, %v901_v51 }
 0x29a   :  { %v1501_v6 = vpop.f32.mrf.mxu0 }
 0x29b   :  { %v913_v9 = vadd.f32 %v1501_v6, %v1794_v8 }
 0x29c   :  { %v904_v10 = vpop.f32.mrf.mxu0 }
 0x29d   :  { %v1281_v21 = vpack.c.bf16 %v913_v9, %v910_v60  ;;  %v905_v12 = vadd.f32 %v1794_v8, %v904_v10 }
 0x29e   :  { %v1504_v13 = vpop.f32.mrf.mxu0 }
 0x29f   :  { %1305 = vst [vmem:[%s1883_s7 + $0x68] sm:$0xff] %v1281_v21   ;;  %v1276_v14 = vpack.c.bf16 %v905_v12, %v902_v11  ;;  %v926_v17 = vadd.f32 %v1504_v13, %v1794_v8 }
 0x2a0   :  { %v917_v15 = vpop.f32.mrf.mxu0 }
 0x2a1   :  { %1304 = vst [vmem:[%s1883_s7 + $0x60] sm:$0xff] %v1276_v14   ;;  %v918_v33 = vadd.f32 %v1794_v8, %v917_v15 }
 0x2a2   :  { %v1505_v16 = vpop.f32.mrf.mxu0 }
 0x2a3   :  { %v929_v7 = vadd.f32 %v1505_v16, %v1794_v8 }
 0x2a4   :  { %v920_v18 = vpop.f32.mrf.mxu0 }
 0x2a5   :  { %v1291_v19 = vpack.c.bf16 %v929_v7, %v926_v17  ;;  %v921_v20 = vadd.f32 %v1794_v8, %v920_v18 }
 0x2a7   :  { %1307 = vst [vmem:[%s1883_s7 + $0x78] sm:$0xff] %v1291_v19   ;;  %v1286_v22 = vpack.c.bf16 %v921_v20, %v918_v33 }
 0x2a9   :  { %1306 = vst [vmem:[%s1883_s7 + $0x70] sm:$0xff] %v1286_v22  }

// kernel: _forward_impl.1
= control target key start
LH: loop header
LB: loop body
LE: loop exit
PB: predicated region body
PF: predicated region fallthrough
CT: control target
= control target key end

     0   :  { %vm162_vm0 = vcmask 261120   ;;  %s1876_s1 = inlined_call_operand.vmem [shape: bf16[32,128], index: 1, kind: input, shape index: {}]   ;;  %s1877_s0 = inlined_call_operand.vmem [shape: bf16[256,32], index: 0, kind: input, shape index: {}]   ;;  %s1878_s3 = inlined_call_operand.vmem [shape: bf16[128,128], index: 3, kind: input, shape index: {}]   ;;  %s1879_s5 = inlined_call_operand.vmem [shape: bf16[128,128], index: 5, kind: input, shape index: {}]   ;;  %s1880_s2 = inlined_call_operand.vmem [shape: f32[1,128], index: 2, kind: input, shape index: {}]   ;;  %s1881_s4 = inlined_call_operand.vmem [shape: f32[1,128], index: 4, kind: input, shape index: {}]   ;;  %s1882_s6 = inlined_call_operand.vmem [shape: f32[1,128], index: 6, kind: input, shape index: {}]   ;;  %s1883_s7 = inlined_call_operand.vmem [shape: bf16[256,128], index: 7, kind: output, shape index: {}]  }
   0x1   :  { %v1510_v0 = vld [vmem:[%s1876_s1 + $0x8] sm:$0xff]   ;;  %v1511_v1 = vld [vmem:[%s1876_s1] sm:$0xff]   ;;  %v1514_v4 = vld [vmem:[%s1877_s0 + $0x10] sm:$0xff]  }
   0x2   :  { %1374 = vmatprep.subr.bf16.mxu0 %v1510_v0  ;;  %v1512_v2 = vld [vmem:[%s1877_s0] sm:$0xff]   ;;  %1506 = vmatprep.subr.bf16.mxu1 %v1510_v0  ;;  %v1513_v3 = vld [vmem:[%s1877_s0 + $0x8] sm:$0xff]   ;;  %v1522_v7 = vld [vmem:[%s1877_s0 + $0x50] sm:$0xff]  }
   0x3   :  { %1375 = vmatpush3.bf16.msra.mxu0 %v1510_v0  ;;  %1508 = vmatpush3.bf16.msra.mxu1 %v1510_v0  ;;  %v1520_v5 = vld [vmem:[%s1877_s0 + $0x40] sm:$0xff]   ;;  %v1521_v6 = vld [vmem:[%s1877_s0 + $0x48] sm:$0xff]   ;;  %v1515_v8 = vld [vmem:[%s1877_s0 + $0x18] sm:$0xff]  }
   0x4   :  { %1376 = vmatprep.subr.bf16.mxu0 %v1511_v1  ;;  %1378 = vmatprep.mubr.msk.bf16.mxu0 %vm162_vm0, %v1512_v2  ;;  %v1516_v9 = vld [vmem:[%s1877_s0 + $0x20] sm:$0xff]   ;;  %v1523_v10 = vld [vmem:[%s1877_s0 + $0x58] sm:$0xff]   ;;  %v1529_v13 = vld [vmem:[%s1878_s3 + $0x30] sm:$0xff]  }
   0x5   :  { %1507 = vmatprep.subr.bf16.mxu1 %v1511_v1  ;;  %1394 = vmatprep.mubr.msk.bf16.mxu1 %vm162_vm0, %v1520_v5  ;;  %v1524_v11 = vld [vmem:[%s1877_s0 + $0x60] sm:$0xff]   ;;  %v1528_v12 = vld [vmem:[%s1878_s3 + $0x38] sm:$0xff]   ;;  %v1517_v14 = vld [vmem:[%s1877_s0 + $0x28] sm:$0xff]  }
   0x6   :  { %v1518_v15 = vld [vmem:[%s1877_s0 + $0x30] sm:$0xff]   ;;  %v1530_v16 = vld [vmem:[%s1878_s3 + $0x28] sm:$0xff]   ;;  %v1531_v19 = vld [vmem:[%s1878_s3 + $0x20] sm:$0xff]  }
   0x7   :  { %1377 = vmatpush3.bf16.msra.mxu0 %v1511_v1  ;;  %1509 = vmatpush3.bf16.msra.mxu1 %v1511_v1  ;;  %v1525_v17 = vld [vmem:[%s1877_s0 + $0x68] sm:$0xff]   ;;  %v1526_v18 = vld [vmem:[%s1877_s0 + $0x70] sm:$0xff]   ;;  %v1519_v20 = vld [vmem:[%s1877_s0 + $0x38] sm:$0xff]  }
   0x8   :  { %1410 = vmatprep.subr.bf16.mxu1 %v1528_v12  ;;  %v1532_v21 = vld [vmem:[%s1878_s3 + $0x18] sm:$0xff]   ;;  %v1533_v23 = vld [vmem:[%s1878_s3 + $0x10] sm:$0xff]   ;;  %v1534_v24 = vld [vmem:[%s1878_s3 + $0x8] sm:$0xff]  }
   0x9   :  { %v1527_v22 = vld [vmem:[%s1877_s0 + $0x78] sm:$0xff]   ;;  %v1535_v25 = vld [vmem:[%s1878_s3] sm:$0xff]   ;;  %v1537_v27 = vld [vmem:[%s1879_s5 + $0x30] sm:$0xff]  }
   0xa   :  { %1379 = vmatmul.mubr.msk.bf16.vlgmr.msra.gmra.mxu0 %vm162_vm0, %v1513_v3  ;;  %1395 = vmatmul.mubr.msk.bf16.vlgmr.msra.gmra.mxu1 %vm162_vm0, %v1521_v6  ;;  %v1536_v26 = vld [vmem:[%s1879_s5 + $0x38] sm:$0xff]   ;;  %v1538_v28 = vld [vmem:[%s1879_s5 + $0x28] sm:$0xff]   ;;  %v1539_v29 = vld [vmem:[%s1879_s5 + $0x20] sm:$0xff]  }
   0xb   :  { %1382 = vmatprep.mubr.msk.bf16.mxu0 %vm162_vm0, %v1514_v4  ;;  %1398 = vmatprep.mubr.msk.bf16.mxu1 %vm162_vm0, %v1522_v7  ;;  %v1540_v30 = vld [vmem:[%s1879_s5 + $0x18] sm:$0xff]   ;;  %v1696_v33 = vld [vmem:[%s1880_s2] ss:$0 sm:$0xff] }
   0xc   :  { %1411 = vmatpush3.bf16.msra.mxu1 %v1528_v12  ;;  %1458 = vmatprep.subr.bf16.mxu0 %v1536_v26 }
   0xd   :  { %1412 = vmatprep.subr.bf16.mxu1 %v1529_v13  ;;  %1459 = vmatpush3.bf16.msra.mxu0 %v1536_v26 }
   0xe   :  { %1460 = vmatprep.subr.bf16.mxu0 %v1537_v27 }
  0x10   :  { %1413 = vmatpush3.bf16.msra.mxu1 %v1529_v13 }
  0x11   :  { %1414 = vmatprep.subr.bf16.mxu1 %v1530_v16  ;;  %1461 = vmatpush3.bf16.msra.mxu0 %v1537_v27 }
  0x12   :  { %1383 = vmatmul.mubr.msk.bf16.gmra.mxu0 %vm162_vm0, %v1515_v8  ;;  %1399 = vmatmul.mubr.msk.bf16.gmra.mxu1 %vm162_vm0, %v1523_v10 }
  0x13   :  { %1386 = vmatprep.mubr.msk.bf16.mxu0 %vm162_vm0, %v1516_v9  ;;  %1402 = vmatprep.mubr.msk.bf16.mxu1 %vm162_vm0, %v1524_v11 }
  0x14   :  { %1415 = vmatpush3.bf16.msra.mxu1 %v1530_v16  ;;  %1462 = vmatprep.subr.bf16.mxu0 %v1538_v28 }
  0x15   :  { %1416 = vmatprep.subr.bf16.mxu1 %v1531_v19  ;;  %1463 = vmatpush3.bf16.msra.mxu0 %v1538_v28 }
  0x16   :  { %1464 = vmatprep.subr.bf16.mxu0 %v1539_v29 }
  0x18   :  { %1417 = vmatpush3.bf16.msra.mxu1 %v1531_v19 }
  0x19   :  { %1418 = vmatprep.subr.bf16.mxu1 %v1532_v21  ;;  %1465 = vmatpush3.bf16.msra.mxu0 %v1539_v29 }
  0x1a   :  { %1387 = vmatmul.mubr.msk.bf16.gmra.mxu0 %vm162_vm0, %v1517_v14  ;;  %1403 = vmatmul.mubr.msk.bf16.gmra.mxu1 %vm162_vm0, %v1525_v17 }
  0x1b   :  { %1390 = vmatprep.mubr.msk.bf16.mxu0 %vm162_vm0, %v1518_v15  ;;  %1406 = vmatprep.mubr.msk.bf16.mxu1 %vm162_vm0, %v1526_v18 }
  0x1c   :  { %1419 = vmatpush3.bf16.msra.mxu1 %v1532_v21  ;;  %1466 = vmatprep.subr.bf16.mxu0 %v1540_v30 }
  0x1d   :  { %1420 = vmatprep.subr.bf16.mxu1 %v1533_v23  ;;  %1467 = vmatpush3.bf16.msra.mxu0 %v1540_v30 }
  0x20   :  { %1421 = vmatpush3.bf16.msra.mxu1 %v1533_v23 }
  0x21   :  { %1422 = vmatprep.subr.bf16.mxu1 %v1534_v24 }
  0x22   :  { %1391 = vmatmul.mubr.msk.bf16.gmra.mxu0 %vm162_vm0, %v1519_v20  ;;  %1407 = vmatmul.mubr.msk.bf16.gmra.mxu1 %vm162_vm0, %v1527_v22 }
  0x24   :  { %1423 = vmatpush3.bf16.msra.mxu1 %v1534_v24 }
  0x25   :  { %1424 = vmatprep.subr.bf16.mxu1 %v1535_v25 }
  0x28   :  { %1425 = vmatpush3.bf16.msra.mxu1 %v1535_v25 }
  0xca   :  { %v1380_v31 = vpop.f32.mrf.mxu0  ;;  %v1698_v34 = vpop.f32.mrf.mxu1 }
  0xcb   :  { %v254_v39 = vadd.f32 %v1380_v31, %v1696_v33 }
  0xcc   :  { %v245_v32 = vpop.f32.mrf.mxu0  ;;  %v309_v38 = vpop.f32.mrf.mxu1 }
  0xcd   :  { %v246_v36 = vadd.f32 %v1696_v33, %v245_v32  ;;  %v374_v48 = vmax.f32 %v254_v39, 0.0  ;;  %v310_v21 = vadd.f32 %v1696_v33, %v309_v38 }
  0xce   :  { %v1381_v35 = vpop.f32.mrf.mxu0  ;;  %v1704_v42 = vpop.f32.mrf.mxu1 }
  0xcf   :  { %v257_v37 = vadd.f32 %v1381_v35, %v1696_v33  ;;  %v372_v45 = vmax.f32 %v246_v36, 0.0  ;;  %v388_v30 = vmax.f32 %v310_v21, 0.0  ;;  %v1757_v21 = vld [vmem:[%s1881_s4] ss:$0 sm:$0xff] }
  0xd0   :  { %v248_v40 = vpop.f32.mrf.mxu0  ;;  %v312_v47 = vpop.f32.mrf.mxu1 }
  0xd1   :  { %v249_v41 = vadd.f32 %v1696_v33, %v248_v40  ;;  %v375_v43 = vmax.f32 %v257_v37, 0.0  ;;  %v313_v22 = vadd.f32 %v1696_v33, %v312_v47  ;;  %v321_v47 = vadd.f32 %v1704_v42, %v1696_v33 }
  0xd2   :  { %v1384_v44 = vpop.f32.mrf.mxu0  ;;  %v1706_v51 = vpop.f32.mrf.mxu1 }
  0xd3   :  { %v373_v46 = vmax.f32 %v249_v41, 0.0  ;;  %v405_v52 = vpack.c.bf16 %v375_v43, %v374_v48  ;;  %v270_v57 = vadd.f32 %v1384_v44, %v1696_v33  ;;  %v389_v32 = vmax.f32 %v313_v22, 0.0 }
  0xd4   :  { %v261_v49 = vpop.f32.mrf.mxu0  ;;  %v325_v56 = vpop.f32.mrf.mxu1 }
  0xd5   :  { %v404_v50 = vpack.c.bf16 %v373_v46, %v372_v45  ;;  %v262_v54 = vadd.f32 %v1696_v33, %v261_v49  ;;  %v378_v2 = vmax.f32 %v270_v57, 0.0  ;;  %v412_v41 = vpack.c.bf16 %v389_v32, %v388_v30 }
  0xd6   :  { %v1385_v53 = vpop.f32.mrf.mxu0  ;;  %v1712_v60 = vpop.f32.mrf.mxu1  ;;  %v326_v43 = vadd.f32 %v1696_v33, %v325_v56  ;;  %v318_v45 = vadd.f32 %v1698_v34, %v1696_v33  ;;  %v334_v34 = vadd.f32 %v1706_v51, %v1696_v33 }
  0xd7   :  { %v273_v55 = vadd.f32 %v1385_v53, %v1696_v33  ;;  %1426 = vmatprep.mubr.bf16.mxu1 %v404_v50  ;;  %v376_v63 = vmax.f32 %v262_v54, 0.0  ;;  %v391_v53 = vmax.f32 %v321_v47, 0.0  ;;  %v337_v42 = vadd.f32 %v1712_v60, %v1696_v33 }
  0xd8   :  { %v264_v58 = vpop.f32.mrf.mxu0  ;;  %1427 = vmatmul.mubr.bf16.vlgmr.msra.gmra.mxu1 %v405_v52  ;;  %v328_v1 = vpop.f32.mrf.mxu1  ;;  %v392_v49 = vmax.f32 %v326_v43, 0.0  ;;  %v390_v52 = vmax.f32 %v318_v45, 0.0 }
  0xd9   :  { %v265_v59 = vadd.f32 %v1696_v33, %v264_v58  ;;  %v379_v61 = vmax.f32 %v273_v55, 0.0  ;;  %v329_v44 = vadd.f32 %v1696_v33, %v328_v1 }
  0xda   :  { %v1388_v62 = vpop.f32.mrf.mxu0  ;;  %v1714_v7 = vpop.f32.mrf.mxu1  ;;  %v413_v58 = vpack.c.bf16 %v391_v53, %v390_v52 }
  0xdb   :  { %v377_v0 = vmax.f32 %v265_v59, 0.0  ;;  %v407_v5 = vpack.c.bf16 %v379_v61, %v378_v2  ;;  %v286_v10 = vadd.f32 %v1388_v62, %v1696_v33  ;;  %v393_v50 = vmax.f32 %v329_v44, 0.0 }
  0xdc   :  { %v277_v3 = vpop.f32.mrf.mxu0  ;;  %v341_v15 = vpop.f32.mrf.mxu1  ;;  %v350_v51 = vadd.f32 %v1714_v7, %v1696_v33  ;;  %v1541_v7 = vld [vmem:[%s1879_s5 + $0x10] sm:$0xff]  }
  0xdd   :  { %v406_v4 = vpack.c.bf16 %v377_v0, %v376_v63  ;;  %v278_v8 = vadd.f32 %v1696_v33, %v277_v3  ;;  %v382_v18 = vmax.f32 %v286_v10, 0.0  ;;  %v414_v55 = vpack.c.bf16 %v393_v50, %v392_v49  ;;  %1468 = vmatprep.subr.bf16.mxu0 %v1541_v7 }
  0xde   :  { %v1389_v6 = vpop.f32.mrf.mxu0  ;;  %v1405_v25 = vpop.f32.mrf.mxu1  ;;  %v342_v56 = vadd.f32 %v1696_v33, %v341_v15  ;;  %v394_v63 = vmax.f32 %v334_v34, 0.0  ;;  %v395_v0 = vmax.f32 %v337_v42, 0.0  ;;  %1469 = vmatpush3.bf16.msra.mxu0 %v1541_v7 }
  0xdf   :  { %v289_v9 = vadd.f32 %v1389_v6, %v1696_v33  ;;  %1430 = vmatprep.mubr.bf16.mxu1 %v406_v4  ;;  %v380_v16 = vmax.f32 %v278_v8, 0.0  ;;  %v353_v6 = vadd.f32 %v1405_v25, %v1696_v33 }
  0xe0   :  { %v280_v11 = vpop.f32.mrf.mxu0  ;;  %1431 = vmatmul.mubr.bf16.gmra.mxu1 %v407_v5  ;;  %v344_v36 = vpop.f32.mrf.mxu1  ;;  %v396_v61 = vmax.f32 %v342_v56, 0.0  ;;  %v415_v5 = vpack.c.bf16 %v395_v0, %v394_v63 }
  0xe1   :  { %v281_v12 = vadd.f32 %v1696_v33, %v280_v11  ;;  %v383_v13 = vmax.f32 %v289_v9, 0.0  ;;  %v345_v57 = vadd.f32 %v1696_v33, %v344_v36  ;;  %v398_v9 = vmax.f32 %v350_v51, 0.0 }
  0xe2   :  { %v1392_v14 = vpop.f32.mrf.mxu0  ;;  %v1408_v48 = vpop.f32.mrf.mxu1  ;;  %v399_v10 = vmax.f32 %v353_v6, 0.0 }
  0xe3   :  { %v381_v17 = vmax.f32 %v281_v12, 0.0  ;;  %v409_v23 = vpack.c.bf16 %v383_v13, %v382_v18  ;;  %v302_v28 = vadd.f32 %v1392_v14, %v1696_v33  ;;  %v397_v62 = vmax.f32 %v345_v57, 0.0  ;;  %v1542_v18 = vld [vmem:[%s1879_s5 + $0x8] sm:$0xff]  }
  0xe4   :  { %v293_v19 = vpop.f32.mrf.mxu0  ;;  %v357_v54 = vpop.f32.mrf.mxu1  ;;  %v417_v12 = vpack.c.bf16 %v399_v10, %v398_v9  ;;  %v366_v13 = vadd.f32 %v1408_v48, %v1696_v33  ;;  %1470 = vmatprep.subr.bf16.mxu0 %v1542_v18 }
  0xe5   :  { %v408_v20 = vpack.c.bf16 %v381_v17, %v380_v16  ;;  %v294_v26 = vadd.f32 %v1696_v33, %v293_v19  ;;  %v386_v39 = vmax.f32 %v302_v28, 0.0  ;;  %v416_v2 = vpack.c.bf16 %v397_v62, %v396_v61  ;;  %1471 = vmatpush3.bf16.msra.mxu0 %v1542_v18 }
  0xe6   :  { %v1393_v24 = vpop.f32.mrf.mxu0  ;;  %v1409_v59 = vpop.f32.mrf.mxu1  ;;  %v358_v3 = vadd.f32 %v1696_v33, %v357_v54  ;;  %v402_v15 = vmax.f32 %v366_v13, 0.0 }
  0xe7   :  { %v305_v27 = vadd.f32 %v1393_v24, %v1696_v33  ;;  %1434 = vmatprep.mubr.bf16.mxu1 %v408_v20  ;;  %v384_v37 = vmax.f32 %v294_v26, 0.0  ;;  %v369_v14 = vadd.f32 %v1409_v59, %v1696_v33 }
  0xe8   :  { %v296_v29 = vpop.f32.mrf.mxu0  ;;  %1435 = vmatmul.mubr.bf16.gmra.mxu1 %v409_v23  ;;  %v360_v1 = vpop.f32.mrf.mxu1  ;;  %v400_v60 = vmax.f32 %v358_v3, 0.0 }
  0xe9   :  { %v297_v31 = vadd.f32 %v1696_v33, %v296_v29  ;;  %v387_v35 = vmax.f32 %v305_v27, 0.0  ;;  %v361_v4 = vadd.f32 %v1696_v33, %v360_v1  ;;  %v403_v16 = vmax.f32 %v369_v14, 0.0  ;;  %v1543_v33 = vld [vmem:[%s1879_s5] sm:$0xff]  }
  0xea   :  { %1472 = vmatprep.subr.bf16.mxu0 %v1543_v33 }
  0xeb   :  { %v385_v38 = vmax.f32 %v297_v31, 0.0  ;;  %v411_v46 = vpack.c.bf16 %v387_v35, %v386_v39  ;;  %v401_v8 = vmax.f32 %v361_v4, 0.0  ;;  %v419_v17 = vpack.c.bf16 %v403_v16, %v402_v15  ;;  %1473 = vmatpush3.bf16.msra.mxu0 %v1543_v33 }
  0xed   :  { %v410_v40 = vpack.c.bf16 %v385_v38, %v384_v37  ;;  %v418_v11 = vpack.c.bf16 %v401_v8, %v400_v60 }
  0xef   :  { %1438 = vmatprep.mubr.bf16.mxu1 %v410_v40 }
  0xf0   :  { %1439 = vmatmul.mubr.bf16.gmra.mxu1 %v411_v46 }
  0xf1   :  { %1442 = vmatprep.mubr.bf16.mxu1 %v412_v41 }
  0xf8   :  { %1443 = vmatmul.mubr.bf16.gmra.mxu1 %v413_v58 }
  0xf9   :  { %1446 = vmatprep.mubr.bf16.mxu1 %v414_v55 }
 0x100   :  { %1447 = vmatmul.mubr.bf16.gmra.mxu1 %v415_v5 }
 0x101   :  { %1450 = vmatprep.mubr.bf16.mxu1 %v416_v2 }
 0x108   :  { %1451 = vmatmul.mubr.bf16.gmra.mxu1 %v417_v12 }
 0x109   :  { %1454 = vmatprep.mubr.bf16.mxu1 %v418_v11 }
 0x110   :  { %1455 = vmatmul.mubr.bf16.gmra.mxu1 %v419_v17 }
 0x198   :  { %v1428_v19 = vpop.f32.mrf.mxu1 }
 0x199   :  { %v534_v25 = vadd.f32 %v1428_v19, %v1757_v21 }
 0x19a   :  { %v525_v20 = vpop.f32.mrf.mxu1 }
 0x19b   :  { %v526_v23 = vadd.f32 %v1757_v21, %v525_v20  ;;  %v654_v32 = vmax.f32 %v534_v25, 0.0 }
 0x19c   :  { %v1429_v22 = vpop.f32.mrf.mxu1 }
 0x19d   :  { %v537_v24 = vadd.f32 %v1429_v22, %v1757_v21  ;;  %v652_v30 = vmax.f32 %v526_v23, 0.0 }
 0x19e   :  { %v528_v26 = vpop.f32.mrf.mxu1 }
 0x19f   :  { %v529_v27 = vadd.f32 %v1757_v21, %v528_v26  ;;  %v655_v28 = vmax.f32 %v537_v24, 0.0 }
 0x1a0   :  { %v1432_v29 = vpop.f32.mrf.mxu1 }
 0x1a1   :  { %v653_v31 = vmax.f32 %v529_v27, 0.0  ;;  %v685_v37 = vpack.c.bf16 %v655_v28, %v654_v32  ;;  %v550_v41 = vadd.f32 %v1432_v29, %v1757_v21 }
 0x1a2   :  { %v541_v35 = vpop.f32.mrf.mxu1 }
 0x1a3   :  { %v684_v36 = vpack.c.bf16 %v653_v31, %v652_v30  ;;  %v542_v39 = vadd.f32 %v1757_v21, %v541_v35  ;;  %v658_v49 = vmax.f32 %v550_v41, 0.0 }
 0x1a4   :  { %v1433_v38 = vpop.f32.mrf.mxu1 }
 0x1a5   :  { %v553_v40 = vadd.f32 %v1433_v38, %v1757_v21  ;;  %1474 = vmatprep.mubr.bf16.mxu0 %v684_v36  ;;  %v656_v47 = vmax.f32 %v542_v39, 0.0 }
 0x1a6   :  { %v544_v43 = vpop.f32.mrf.mxu1  ;;  %1475 = vmatmul.mubr.bf16.vlgmr.msra.gmra.mxu0 %v685_v37 }
 0x1a7   :  { %v545_v44 = vadd.f32 %v1757_v21, %v544_v43  ;;  %v659_v45 = vmax.f32 %v553_v40, 0.0 }
 0x1a8   :  { %v1436_v46 = vpop.f32.mrf.mxu1 }
 0x1a9   :  { %v657_v48 = vmax.f32 %v545_v44, 0.0  ;;  %v687_v53 = vpack.c.bf16 %v659_v45, %v658_v49  ;;  %v566_v57 = vadd.f32 %v1436_v46, %v1757_v21 }
 0x1aa   :  { %v557_v50 = vpop.f32.mrf.mxu1 }
 0x1ab   :  { %v686_v52 = vpack.c.bf16 %v657_v48, %v656_v47  ;;  %v558_v55 = vadd.f32 %v1757_v21, %v557_v50  ;;  %v662_v63 = vmax.f32 %v566_v57, 0.0 }
 0x1ac   :  { %v1437_v54 = vpop.f32.mrf.mxu1 }
 0x1ad   :  { %v569_v56 = vadd.f32 %v1437_v54, %v1757_v21  ;;  %1478 = vmatprep.mubr.bf16.mxu0 %v686_v52  ;;  %v660_v61 = vmax.f32 %v558_v55, 0.0 }
 0x1ae   :  { %v560_v58 = vpop.f32.mrf.mxu1  ;;  %1479 = vmatmul.mubr.bf16.gmra.mxu0 %v687_v53 }
 0x1af   :  { %v561_v34 = vadd.f32 %v1757_v21, %v560_v58  ;;  %v663_v42 = vmax.f32 %v569_v56, 0.0 }
 0x1b0   :  { %v1440_v59 = vpop.f32.mrf.mxu1 }
 0x1b1   :  { %v661_v62 = vmax.f32 %v561_v34, 0.0  ;;  %v689_v2 = vpack.c.bf16 %v663_v42, %v662_v63  ;;  %v582_v51 = vadd.f32 %v1440_v59, %v1757_v21 }
 0x1b2   :  { %v573_v0 = vpop.f32.mrf.mxu1 }
 0x1b3   :  { %v688_v1 = vpack.c.bf16 %v661_v62, %v660_v61  ;;  %v574_v4 = vadd.f32 %v1757_v21, %v573_v0  ;;  %v666_v12 = vmax.f32 %v582_v51, 0.0 }
 0x1b4   :  { %v1441_v3 = vpop.f32.mrf.mxu1 }
 0x1b5   :  { %v585_v5 = vadd.f32 %v1441_v3, %v1757_v21  ;;  %1482 = vmatprep.mubr.bf16.mxu0 %v688_v1  ;;  %v664_v10 = vmax.f32 %v574_v4, 0.0 }
 0x1b6   :  { %v576_v6 = vpop.f32.mrf.mxu1  ;;  %1483 = vmatmul.mubr.bf16.gmra.mxu0 %v689_v2 }
 0x1b7   :  { %v577_v60 = vadd.f32 %v1757_v21, %v576_v6  ;;  %v667_v8 = vmax.f32 %v585_v5, 0.0 }
 0x1b8   :  { %v1444_v9 = vpop.f32.mrf.mxu1 }
 0x1b9   :  { %v665_v11 = vmax.f32 %v577_v60, 0.0  ;;  %v691_v15 = vpack.c.bf16 %v667_v8, %v666_v12  ;;  %v598_v18 = vadd.f32 %v1444_v9, %v1757_v21  ;;  %v1794_v8 = vld [vmem:[%s1882_s6] ss:$0 sm:$0xff] }
 0x1ba   :  { %v589_v13 = vpop.f32.mrf.mxu1 }
 0x1bb   :  { %v690_v14 = vpack.c.bf16 %v665_v11, %v664_v10  ;;  %v590_v17 = vadd.f32 %v1757_v21, %v589_v13  ;;  %v670_v25 = vmax.f32 %v598_v18, 0.0 }
 0x1bc   :  { %v1445_v16 = vpop.f32.mrf.mxu1 }
 0x1bd   :  { %v601_v7 = vadd.f32 %v1445_v16, %v1757_v21  ;;  %1486 = vmatprep.mubr.bf16.mxu0 %v690_v14  ;;  %v668_v23 = vmax.f32 %v590_v17, 0.0 }
 0x1be   :  { %v592_v33 = vpop.f32.mrf.mxu1  ;;  %1487 = vmatmul.mubr.bf16.gmra.mxu0 %v691_v15 }
 0x1bf   :  { %v593_v19 = vadd.f32 %v1757_v21, %v592_v33  ;;  %v671_v20 = vmax.f32 %v601_v7, 0.0 }
 0x1c0   :  { %v1448_v22 = vpop.f32.mrf.mxu1 }
 0x1c1   :  { %v669_v24 = vmax.f32 %v593_v19, 0.0  ;;  %v693_v28 = vpack.c.bf16 %v671_v20, %v670_v25  ;;  %v614_v32 = vadd.f32 %v1448_v22, %v1757_v21 }
 0x1c2   :  { %v605_v26 = vpop.f32.mrf.mxu1 }
 0x1c3   :  { %v692_v27 = vpack.c.bf16 %v669_v24, %v668_v23  ;;  %v606_v30 = vadd.f32 %v1757_v21, %v605_v26  ;;  %v674_v41 = vmax.f32 %v614_v32, 0.0 }
 0x1c4   :  { %v1449_v29 = vpop.f32.mrf.mxu1 }
 0x1c5   :  { %v617_v31 = vadd.f32 %v1449_v29, %v1757_v21  ;;  %1490 = vmatprep.mubr.bf16.mxu0 %v692_v27  ;;  %v672_v39 = vmax.f32 %v606_v30, 0.0 }
 0x1c6   :  { %v608_v35 = vpop.f32.mrf.mxu1  ;;  %1491 = vmatmul.mubr.bf16.gmra.mxu0 %v693_v28 }
 0x1c7   :  { %v609_v36 = vadd.f32 %v1757_v21, %v608_v35  ;;  %v675_v37 = vmax.f32 %v617_v31, 0.0 }
 0x1c8   :  { %v1452_v38 = vpop.f32.mrf.mxu1 }
 0x1c9   :  { %v673_v40 = vmax.f32 %v609_v36, 0.0  ;;  %v695_v45 = vpack.c.bf16 %v675_v37, %v674_v41  ;;  %v630_v49 = vadd.f32 %v1452_v38, %v1757_v21 }
 0x1ca   :  { %v621_v43 = vpop.f32.mrf.mxu1 }
 0x1cb   :  { %v694_v44 = vpack.c.bf16 %v673_v40, %v672_v39  ;;  %v622_v47 = vadd.f32 %v1757_v21, %v621_v43  ;;  %v678_v57 = vmax.f32 %v630_v49, 0.0 }
 0x1cc   :  { %v1453_v46 = vpop.f32.mrf.mxu1 }
 0x1cd   :  { %v633_v48 = vadd.f32 %v1453_v46, %v1757_v21  ;;  %1494 = vmatprep.mubr.bf16.mxu0 %v694_v44  ;;  %v676_v55 = vmax.f32 %v622_v47, 0.0 }
 0x1ce   :  { %v624_v50 = vpop.f32.mrf.mxu1  ;;  %1495 = vmatmul.mubr.bf16.gmra.mxu0 %v695_v45 }
 0x1cf   :  { %v625_v52 = vadd.f32 %v1757_v21, %v624_v50  ;;  %v679_v53 = vmax.f32 %v633_v48, 0.0 }
 0x1d0   :  { %v1456_v54 = vpop.f32.mrf.mxu1 }
 0x1d1   :  { %v677_v56 = vmax.f32 %v625_v52, 0.0  ;;  %v697_v42 = vpack.c.bf16 %v679_v53, %v678_v57  ;;  %v646_v63 = vadd.f32 %v1456_v54, %v1757_v21 }
 0x1d2   :  { %v637_v58 = vpop.f32.mrf.mxu1 }
 0x1d3   :  { %v696_v34 = vpack.c.bf16 %v677_v56, %v676_v55  ;;  %v638_v61 = vadd.f32 %v1757_v21, %v637_v58  ;;  %v682_v5 = vmax.f32 %v646_v63, 0.0 }
 0x1d4   :  { %v1457_v59 = vpop.f32.mrf.mxu1 }
 0x1d5   :  { %v649_v62 = vadd.f32 %v1457_v59, %v1757_v21  ;;  %1498 = vmatprep.mubr.bf16.mxu0 %v696_v34  ;;  %v680_v3 = vmax.f32 %v638_v61, 0.0 }
 0x1d6   :  { %v640_v0 = vpop.f32.mrf.mxu1  ;;  %1499 = vmatmul.mubr.bf16.gmra.mxu0 %v697_v42 }
 0x1d7   :  { %v641_v1 = vadd.f32 %v1757_v21, %v640_v0  ;;  %v683_v2 = vmax.f32 %v649_v62, 0.0 }
 0x1d9   :  { %v681_v4 = vmax.f32 %v641_v1, 0.0  ;;  %v699_v6 = vpack.c.bf16 %v683_v2, %v682_v5 }
 0x1db   :  { %v698_v51 = vpack.c.bf16 %v681_v4, %v680_v3 }
 0x1dd   :  { %1502 = vmatprep.mubr.bf16.mxu0 %v698_v51 }
 0x1de   :  { %1503 = vmatmul.mubr.bf16.gmra.mxu0 %v699_v6 }
 0x266   :  { %v1476_v60 = vpop.f32.mrf.mxu0 }
 0x267   :  { %v814_v11 = vadd.f32 %v1476_v60, %v1794_v8 }
 0x268   :  { %v805_v9 = vpop.f32.mrf.mxu0 }
 0x269   :  { %v806_v13 = vadd.f32 %v1794_v8, %v805_v9 }
 0x26a   :  { %v1477_v10 = vpop.f32.mrf.mxu0 }
 0x26b   :  { %v817_v21 = vadd.f32 %v1477_v10, %v1794_v8 }
 0x26c   :  { %v808_v12 = vpop.f32.mrf.mxu0 }
 0x26d   :  { %v1221_v14 = vpack.c.bf16 %v817_v21, %v814_v11  ;;  %v809_v15 = vadd.f32 %v1794_v8, %v808_v12 }
 0x26e   :  { %v1480_v16 = vpop.f32.mrf.mxu0 }
 0x26f   :  { %1293 = vst [vmem:[%s1883_s7 + $0x8] sm:$0xff] %v1221_v14   ;;  %v1216_v17 = vpack.c.bf16 %v809_v15, %v806_v13  ;;  %v830_v33 = vadd.f32 %v1480_v16, %v1794_v8 }
 0x270   :  { %v821_v7 = vpop.f32.mrf.mxu0 }
 0x271   :  { %1217 = vst [vmem:[%s1883_s7] sm:$0xff] %v1216_v17   ;;  %v822_v22 = vadd.f32 %v1794_v8, %v821_v7 }
 0x272   :  { %v1481_v18 = vpop.f32.mrf.mxu0 }
 0x273   :  { %v833_v19 = vadd.f32 %v1481_v18, %v1794_v8 }
 0x274   :  { %v824_v20 = vpop.f32.mrf.mxu0 }
 0x275   :  { %v1231_v23 = vpack.c.bf16 %v833_v19, %v830_v33  ;;  %v825_v24 = vadd.f32 %v1794_v8, %v824_v20 }
 0x276   :  { %v1484_v25 = vpop.f32.mrf.mxu0 }
 0x277   :  { %1295 = vst [vmem:[%s1883_s7 + $0x18] sm:$0xff] %v1231_v23   ;;  %v1226_v26 = vpack.c.bf16 %v825_v24, %v822_v22  ;;  %v846_v29 = vadd.f32 %v1484_v25, %v1794_v8 }
 0x278   :  { %v837_v27 = vpop.f32.mrf.mxu0 }
 0x279   :  { %1294 = vst [vmem:[%s1883_s7 + $0x10] sm:$0xff] %v1226_v26   ;;  %v838_v32 = vadd.f32 %v1794_v8, %v837_v27 }
 0x27a   :  { %v1485_v28 = vpop.f32.mrf.mxu0 }
 0x27b   :  { %v849_v30 = vadd.f32 %v1485_v28, %v1794_v8 }
 0x27c   :  { %v840_v31 = vpop.f32.mrf.mxu0 }
 0x27d   :  { %v1241_v35 = vpack.c.bf16 %v849_v30, %v846_v29  ;;  %v841_v36 = vadd.f32 %v1794_v8, %v840_v31 }
 0x27e   :  { %v1488_v37 = vpop.f32.mrf.mxu0 }
 0x27f   :  { %1297 = vst [vmem:[%s1883_s7 + $0x28] sm:$0xff] %v1241_v35   ;;  %v1236_v38 = vpack.c.bf16 %v841_v36, %v838_v32  ;;  %v862_v41 = vadd.f32 %v1488_v37, %v1794_v8 }
 0x280   :  { %v853_v39 = vpop.f32.mrf.mxu0 }
 0x281   :  { %1296 = vst [vmem:[%s1883_s7 + $0x20] sm:$0xff] %v1236_v38   ;;  %v854_v45 = vadd.f32 %v1794_v8, %v853_v39 }
 0x282   :  { %v1489_v40 = vpop.f32.mrf.mxu0 }
 0x283   :  { %v865_v43 = vadd.f32 %v1489_v40, %v1794_v8 }
 0x284   :  { %v856_v44 = vpop.f32.mrf.mxu0 }
 0x285   :  { %v1251_v46 = vpack.c.bf16 %v865_v43, %v862_v41  ;;  %v857_v47 = vadd.f32 %v1794_v8, %v856_v44 }
 0x286   :  { %v1492_v48 = vpop.f32.mrf.mxu0 }
 0x287   :  { %1299 = vst [vmem:[%s1883_s7 + $0x38] sm:$0xff] %v1251_v46   ;;  %v1246_v49 = vpack.c.bf16 %v857_v47, %v854_v45  ;;  %v878_v53 = vadd.f32 %v1492_v48, %v1794_v8 }
 0x288   :  { %v869_v50 = vpop.f32.mrf.mxu0 }
 0x289   :  { %1298 = vst [vmem:[%s1883_s7 + $0x30] sm:$0xff] %v1246_v49   ;;  %v870_v56 = vadd.f32 %v1794_v8, %v869_v50 }
 0x28a   :  { %v1493_v52 = vpop.f32.mrf.mxu0 }
 0x28b   :  { %v881_v54 = vadd.f32 %v1493_v52, %v1794_v8 }
 0x28c   :  { %v872_v55 = vpop.f32.mrf.mxu0 }
 0x28d   :  { %v1261_v57 = vpack.c.bf16 %v881_v54, %v878_v53  ;;  %v873_v58 = vadd.f32 %v1794_v8, %v872_v55 }
 0x28e   :  { %v1496_v34 = vpop.f32.mrf.mxu0 }
 0x28f   :  { %1301 = vst [vmem:[%s1883_s7 + $0x48] sm:$0xff] %v1261_v57   ;;  %v1256_v42 = vpack.c.bf16 %v873_v58, %v870_v56  ;;  %v894_v62 = vadd.f32 %v1496_v34, %v1794_v8 }
 0x290   :  { %v885_v59 = vpop.f32.mrf.mxu0 }
 0x291   :  { %1300 = vst [vmem:[%s1883_s7 + $0x40] sm:$0xff] %v1256_v42   ;;  %v886_v1 = vadd.f32 %v1794_v8, %v885_v59 }
 0x292   :  { %v1497_v61 = vpop.f32.mrf.mxu0 }
 0x293   :  { %v897_v63 = vadd.f32 %v1497_v61, %v1794_v8 }
 0x294   :  { %v888_v0 = vpop.f32.mrf.mxu0 }
 0x295   :  { %v1271_v2 = vpack.c.bf16 %v897_v63, %v894_v62  ;;  %v889_v3 = vadd.f32 %v1794_v8, %v888_v0 }
 0x296   :  { %v1500_v4 = vpop.f32.mrf.mxu0 }
 0x297   :  { %1303 = vst [vmem:[%s1883_s7 + $0x58] sm:$0xff] %v1271_v2   ;;  %v1266_v5 = vpack.c.bf16 %v889_v3, %v886_v1  ;;  %v910_v60 = vadd.f32 %v1500_v4, %v1794_v8 }
 0x298   :  { %v901_v51 = vpop.f32.mrf.mxu0 }
 0x299   :  { %1302 = vst [vmem:[%s1883_s7 + $0x50] sm:$0xff] %v1266_v5   ;;  %v902_v11 = vadd.f32 %v1794_v8, %v901_v51 }
 0x29a   :  { %v1501_v6 = vpop.f32.mrf.mxu0 }
 0x29b   :  { %v913_v9 = vadd.f32 %v1501_v6, %v1794_v8 }
 0x29c   :  { %v904_v10 = vpop.f32.mrf.mxu0 }
 0x29d   :  { %v1281_v21 = vpack.c.bf16 %v913_v9, %v910_v60  ;;  %v905_v12 = vadd.f32 %v1794_v8, %v904_v10 }
 0x29e   :  { %v1504_v13 = vpop.f32.mrf.mxu0 }
 0x29f   :  { %1305 = vst [vmem:[%s1883_s7 + $0x68] sm:$0xff] %v1281_v21   ;;  %v1276_v14 = vpack.c.bf16 %v905_v12, %v902_v11  ;;  %v926_v17 = vadd.f32 %v1504_v13, %v1794_v8 }
 0x2a0   :  { %v917_v15 = vpop.f32.mrf.mxu0 }
 0x2a1   :  { %1304 = vst [vmem:[%s1883_s7 + $0x60] sm:$0xff] %v1276_v14   ;;  %v918_v33 = vadd.f32 %v1794_v8, %v917_v15 }
 0x2a2   :  { %v1505_v16 = vpop.f32.mrf.mxu0 }
 0x2a3   :  { %v929_v7 = vadd.f32 %v1505_v16, %v1794_v8 }
 0x2a4   :  { %v920_v18 = vpop.f32.mrf.mxu0 }
 0x2a5   :  { %v1291_v19 = vpack.c.bf16 %v929_v7, %v926_v17  ;;  %v921_v20 = vadd.f32 %v1794_v8, %v920_v18 }
 0x2a7   :  { %1307 = vst [vmem:[%s1883_s7 + $0x78] sm:$0xff] %v1291_v19   ;;  %v1286_v22 = vpack.c.bf16 %v921_v20, %v918_v33 }
 0x2a9   :  { %1306 = vst [vmem:[%s1883_s7 + $0x70] sm:$0xff] %v1286_v22  }

</bundles_post_ra>
